<compile_context>
chip_gen: v6e
topology: v6e:2x2x1
jax: 0.10.0
libtpu: 0.0.40
codegen_flags: <defaults>
</compile_context>

<pallas_src>
import math
import functools

import jax
import jax.numpy as jnp
from jax import lax
from jax.experimental import pallas as pl
from jax.experimental.pallas import tpu as pltpu


# ---------------------------------------------------------------------------
# Pallas kernel: whole encoder stack, whole batch, one invocation.
# ---------------------------------------------------------------------------
def _encoder_stack_kernel(x_ref, wo_t_ref, w1_t_ref, w2_ref, vec_ref, b1_ref,
                          out_ref, *, heads, head_dim, n_batch, seq,
                          num_layers):
    embed = heads * head_dim
    scale = 1.0 / math.sqrt(head_dim)
    x = x_ref[...]                                    # (N*S, E) f32 in VMEM

    def layer_norm(v, g, b):
        mean = jnp.mean(v, axis=-1, keepdims=True)
        c = v - mean
        var = jnp.mean(c * c, axis=-1, keepdims=True)       # unbiased=False
        return g * (c * lax.rsqrt(var + 1e-6)) + b

    for l in range(num_layers):                       # static unroll (L small)
        wo_t = wo_t_ref[l]                            # (E, E) bf16 = fc_out.weight^T
        w1_t = w1_t_ref[l]                            # (E, F) bf16 = ff1.weight^T
        w2 = w2_ref[l]                                # (E, F) bf16 = ff2.weight (no transpose)
        vecs = vec_ref[l]                             # (6, E) f32
        b1 = b1_ref[l]                                # (1, F) f32

        bo = vecs[0:1]
        g1k, be1k = vecs[1:2], vecs[2:3]
        g2k, be2k = vecs[3:4], vecs[4:5]
        b2 = vecs[5:6]

        # --- multi-head self attention (q = k = v = x; the per-head Linear
        #     layers in the PyTorch module are defined but never applied) ---
        x3 = x.reshape(n_batch, seq, embed)           # leading-dim split only
        ctx_parts = []
        for h in range(heads):
            lo = h * head_dim
            qh = x3[:, :, lo:lo + head_dim]           # (N, S, Dh) lane slice
            # energy[b, q, k] = (qh * scale)[b, q] . qh[b, k]; batched over N,
            # no materialized transpose.
            energy = jnp.einsum("nqd,nkd->nqk", qh * scale, qh,
                                preferred_element_type=jnp.float32)
            p = jnp.exp(energy - jnp.max(energy, axis=-1, keepdims=True))
            attn = p * pl.reciprocal(jnp.sum(p, axis=-1, keepdims=True),
                                     approx=True)
            ctx_parts.append(jnp.einsum("nqk,nkd->nqd", attn, qh,
                                        preferred_element_type=jnp.float32))
        ctx = jnp.concatenate(ctx_parts, axis=-1)     # (N, S, E) lane concat
        ctx = ctx.reshape(n_batch * seq, embed)       # (N*S, E)
        # single fc_out projection (K = E) instead of per-head folds (K = Dh)
        attn_out = jnp.dot(ctx.astype(jnp.bfloat16), wo_t,
                           preferred_element_type=jnp.float32) + bo

        # residual + norm1 (eval-dropout scale folded into g1k / be1k)
        x1 = layer_norm(attn_out + x, g1k, be1k)

        # feed-forward: bf16 operands, f32 accumulation
        h1 = jnp.maximum(
            jnp.dot(x1.astype(jnp.bfloat16), w1_t,
                    preferred_element_type=jnp.float32) + b1, 0.0)
        # contract h1 (N*S, F) with w2 (E, F) over F (lane-dense storage)
        ff = lax.dot_general(h1.astype(jnp.bfloat16), w2,
                             (((1,), (1,)), ((), ())),
                             preferred_element_type=jnp.float32) + b2

        # residual + norm2 (eval-dropout scale folded into g2k / be2k)
        x = layer_norm(ff + x1, g2k, be2k)

    out_ref[...] = x


# ---------------------------------------------------------------------------
# Wrapper: embedding + positional encoding (glue), one-time parameter repack,
# single grid-less pallas_call over the whole stack.
# ---------------------------------------------------------------------------
def transformer_encoder(tokens, params, *, heads, dropout):
    N, S = tokens.shape
    E = params["emb"].shape[1]
    head_dim = E // heads
    keep = 1.0 - dropout
    layers = params["layers"]
    L = len(layers)
    F = layers[0]["w1"].shape[0]

    # glue: embedding + positional encoding + eval-mode input dropout
    x = jnp.take(params["emb"], tokens, axis=0) + params["pe"][None, :S, :]
    x = (x * keep).reshape(N * S, E).astype(jnp.float32)

    # one-time host-side repack:
    #  * stack per-layer weights along a leading L axis, bf16 matmul operands
    #  * wo / w1 pre-transposed; w2 kept (E, F) so its stored last dim is
    #    lane-dense and the contraction handles the transpose
    #  * eval-dropout scale folded into the LayerNorm affine params
    wo_t = jnp.stack([lp["wo"].T for lp in layers]).astype(jnp.bfloat16)   # (L,E,E)
    w1_t = jnp.stack([lp["w1"].T for lp in layers]).astype(jnp.bfloat16)   # (L,E,F)
    w2 = jnp.stack([lp["w2"] for lp in layers]).astype(jnp.bfloat16)       # (L,E,F)
    vec = jnp.stack([jnp.concatenate(
        [lp["bo"], keep * lp["g1"], keep * lp["be1"],
         keep * lp["g2"], keep * lp["be2"], lp["b2"]], axis=0)
        for lp in layers])                                                 # (L,6,E)
    b1 = jnp.stack([lp["b1"] for lp in layers])                            # (L,1,F)

    kernel = functools.partial(_encoder_stack_kernel, heads=heads,
                               head_dim=head_dim, n_batch=N, seq=S,
                               num_layers=L)

    vmem = pl.BlockSpec(memory_space=pltpu.MemorySpace.VMEM)
    y = pl.pallas_call(
        kernel,
        out_shape=jax.ShapeDtypeStruct((N * S, E), jnp.float32),
        in_specs=[vmem] * 6,
        out_specs=vmem,
        # At this config everything fits VMEM trivially, so no grid, no
        # pipelining, default scoped-VMEM limit.  When scaling up: add a
        # ("parallel" row-chunk, "arbitrary" layer) grid, row-tile the FFN so
        # the (rows, F) hidden stays bounded, and raise vmem_limit_bytes via
        # pltpu.CompilerParams.
    )(x, wo_t, w1_t, w2, vec, b1)
    return y.reshape(N, S, E)


# ---------------------------------------------------------------------------
# Pure-JAX reference mirroring the PyTorch forward (eval mode, mask=None).
# ---------------------------------------------------------------------------
def reference_forward(tokens, params, *, heads, dropout):
    E = params["emb"].shape[1]
    Dh = E // heads
    S = tokens.shape[1]

    def ln(v, g, b):
        m = v.mean(-1, keepdims=True)
        var = ((v - m) ** 2).mean(-1, keepdims=True)
        return g * (v - m) / jnp.sqrt(var + 1e-6) + b

    out = jnp.take(params["emb"], tokens, axis=0)
    out = out + params["pe"][None, :S, :]
    out = out * (1.0 - dropout)
    for lp in params["layers"]:
        N, S_, _ = out.shape
        x = out
        q = x.reshape(N, S_, heads, Dh)
        energy = jnp.einsum("nqhd,nkhd->nhqk", q, q)
        attn = jax.nn.softmax(energy / math.sqrt(Dh), axis=-1)
        ctx = jnp.einsum("nhqk,nkhd->nqhd", attn, q).reshape(N, S_, E)
        attn_out = ctx @ lp["wo"].T + lp["bo"][0]
        x1 = ln(attn_out + x, lp["g1"][0], lp["be1"][0]) * (1.0 - dropout)
        h = jax.nn.relu(x1 @ lp["w1"].T + lp["b1"][0])
        ff = h @ lp["w2"].T + lp["b2"][0]
        out = ln(ff + x1, lp["g2"][0], lp["be2"][0]) * (1.0 - dropout)
    return out


# ---------------------------------------------------------------------------
# Deterministic parameter construction.
# ---------------------------------------------------------------------------
def make_params(key, *, vocab, embed, num_layers, heads, forward_expansion,
                max_length):
    F = forward_expansion * embed
    keys = jax.random.split(key, 1 + 6 * num_layers)
    emb = 0.1 * jax.random.normal(keys[0], (vocab, embed), jnp.float32)

    # sinusoidal positional encoding
    position = jnp.arange(max_length, dtype=jnp.float32)[:, None]
    div_term = jnp.exp(jnp.arange(0, embed, 2, dtype=jnp.float32)
                       * (-math.log(10000.0) / embed))
    pe = jnp.zeros((max_length, embed), jnp.float32)
    pe = pe.at[:, 0::2].set(jnp.sin(position * div_term))
    pe = pe.at[:, 1::2].set(jnp.cos(position * div_term))

    layers = []
    for li in range(num_layers):
        k = keys[1 + 6 * li: 1 + 6 * (li + 1)]
        layers.append(dict(
            wo=0.05 * jax.random.normal(k[0], (embed, embed), jnp.float32),
            bo=0.05 * jax.random.normal(k[1], (1, embed), jnp.float32),
            g1=jnp.ones((1, embed), jnp.float32),
            be1=jnp.zeros((1, embed), jnp.float32),
            g2=jnp.ones((1, embed), jnp.float32),
            be2=jnp.zeros((1, embed), jnp.float32),
            w1=0.05 * jax.random.normal(k[2], (F, embed), jnp.float32),
            b1=0.05 * jax.random.normal(k[3], (1, F), jnp.float32),
            w2=0.05 * jax.random.normal(k[4], (embed, F), jnp.float32),
            b2=0.05 * jax.random.normal(k[5], (1, embed), jnp.float32),
        ))
    return dict(emb=emb, pe=pe, layers=layers)


if __name__ == "__main__":
    # Small config consistent with the module's constructor.
    vocab, embed, num_layers, heads = 50, 32, 2, 4
    forward_expansion, dropout, max_length = 4, 0.1, 16
    N, S = 2, 8

    key = jax.random.PRNGKey(0)
    pkey, tkey = jax.random.split(key)
    params = make_params(pkey, vocab=vocab, embed=embed, num_layers=num_layers,
                         heads=heads, forward_expansion=forward_expansion,
                         max_length=max_length)
    tokens = jax.random.randint(tkey, (N, S), 0, vocab, dtype=jnp.int32)

    out = transformer_encoder(tokens, params, heads=heads, dropout=dropout)
    out = jax.block_until_ready(out)

    ref = reference_forward(tokens, params, heads=heads, dropout=dropout)
    ref = jax.block_until_ready(ref)

    assert out.shape == (N, S, embed)
    assert bool(jnp.all(jnp.isfinite(out)))
    assert bool(jnp.allclose(out, ref, atol=5e-2, rtol=5e-2)), "mismatch vs reference"

    print("KERNEL_OK")
</pallas_src>

<mosaic_0001>
module attributes {stable_mosaic.version = 11 : i64} {
  func.func @_encoder_stack_kernel(%arg0: memref<16x32xf32, #tpu.memory_space<vmem>>, %arg1: memref<2x32x32xbf16, #tpu.memory_space<vmem>>, %arg2: memref<2x32x128xbf16, #tpu.memory_space<vmem>>, %arg3: memref<2x32x128xbf16, #tpu.memory_space<vmem>>, %arg4: memref<2x6x32xf32, #tpu.memory_space<vmem>>, %arg5: memref<2x1x128xf32, #tpu.memory_space<vmem>>, %arg6: memref<16x32xf32, #tpu.memory_space<vmem>>) attributes {dimension_semantics = [], scalar_prefetch = 0 : i64, scratch_operands = 0 : i64, tpu.core_type = #tpu.core_type<tc>} {
    %c0 = arith.constant 0 : index
    %c0_0 = arith.constant 0 : index
    %0 = vector.load %arg0[%c0, %c0_0] : memref<16x32xf32, #tpu.memory_space<vmem>>, vector<16x32xf32>
    %c0_1 = arith.constant 0 : index
    %c0_2 = arith.constant 0 : index
    %c0_3 = arith.constant 0 : index
    %1 = vector.load %arg1[%c0_1, %c0_2, %c0_3] : memref<2x32x32xbf16, #tpu.memory_space<vmem>>, vector<1x32x32xbf16>
    %2 = vector.shape_cast %1 : vector<1x32x32xbf16> to vector<32x32xbf16>
    %c0_4 = arith.constant 0 : index
    %c0_5 = arith.constant 0 : index
    %c0_6 = arith.constant 0 : index
    %3 = vector.load %arg2[%c0_4, %c0_5, %c0_6] : memref<2x32x128xbf16, #tpu.memory_space<vmem>>, vector<1x32x128xbf16>
    %4 = vector.shape_cast %3 : vector<1x32x128xbf16> to vector<32x128xbf16>
    %c0_7 = arith.constant 0 : index
    %c0_8 = arith.constant 0 : index
    %c0_9 = arith.constant 0 : index
    %5 = vector.load %arg3[%c0_7, %c0_8, %c0_9] : memref<2x32x128xbf16, #tpu.memory_space<vmem>>, vector<1x32x128xbf16>
    %6 = vector.shape_cast %5 : vector<1x32x128xbf16> to vector<32x128xbf16>
    %c0_10 = arith.constant 0 : index
    %c0_11 = arith.constant 0 : index
    %c0_12 = arith.constant 0 : index
    %7 = vector.load %arg4[%c0_10, %c0_11, %c0_12] : memref<2x6x32xf32, #tpu.memory_space<vmem>>, vector<1x6x32xf32>
    %8 = vector.shape_cast %7 : vector<1x6x32xf32> to vector<6x32xf32>
    %c0_13 = arith.constant 0 : index
    %c0_14 = arith.constant 0 : index
    %c0_15 = arith.constant 0 : index
    %9 = vector.load %arg5[%c0_13, %c0_14, %c0_15] : memref<2x1x128xf32, #tpu.memory_space<vmem>>, vector<1x1x128xf32>
    %10 = vector.shape_cast %9 : vector<1x1x128xf32> to vector<1x128xf32>
    %11 = vector.extract_strided_slice %8 {offsets = [0, 0], sizes = [1, 32], strides = [1, 1]} : vector<6x32xf32> to vector<1x32xf32>
    %12 = vector.extract_strided_slice %8 {offsets = [1, 0], sizes = [1, 32], strides = [1, 1]} : vector<6x32xf32> to vector<1x32xf32>
    %13 = vector.extract_strided_slice %8 {offsets = [2, 0], sizes = [1, 32], strides = [1, 1]} : vector<6x32xf32> to vector<1x32xf32>
    %14 = vector.extract_strided_slice %8 {offsets = [3, 0], sizes = [1, 32], strides = [1, 1]} : vector<6x32xf32> to vector<1x32xf32>
    %15 = vector.extract_strided_slice %8 {offsets = [4, 0], sizes = [1, 32], strides = [1, 1]} : vector<6x32xf32> to vector<1x32xf32>
    %16 = vector.extract_strided_slice %8 {offsets = [5, 0], sizes = [1, 32], strides = [1, 1]} : vector<6x32xf32> to vector<1x32xf32>
    %17 = vector.shape_cast %0 : vector<16x32xf32> to vector<2x8x32xf32>
    %18 = vector.extract_strided_slice %17 {offsets = [0, 0, 0], sizes = [2, 8, 8], strides = [1, 1, 1]} : vector<2x8x32xf32> to vector<2x8x8xf32>
    %cst = arith.constant 0.353553385 : f32
    %19 = vector.broadcast %cst : f32 to vector<2x8x8xf32>
    %20 = arith.mulf %18, %19 : vector<2x8x8xf32>
    "tpu.trace_start"() <{level = 10 : i32, message = "nqd,nkd->nqk"}> : () -> ()
    %cst_16 = arith.constant dense<0.000000e+00> : vector<2x8x8xf32>
    %21 = tpu.matmul %20, %18, %cst_16 {dimension_numbers = #tpu.dot_dimension_numbers<[2], [2], [1], [1], [0, 0, 0, 1, 1, 1], [0], [0]>} : vector<2x8x8xf32>, vector<2x8x8xf32>, vector<2x8x8xf32> -> vector<2x8x8xf32>
    "tpu.trace_stop"() : () -> ()
    %cst_17 = arith.constant dense<0xFF800000> : vector<2x8xf32>
    %22 = vector.multi_reduction <maximumf>, %21, %cst_17 [2] : vector<2x8x8xf32> to vector<2x8xf32>
    %23 = vector.shape_cast %22 : vector<2x8xf32> to vector<2x8x1xf32>
    %24 = vector.broadcast %23 : vector<2x8x1xf32> to vector<2x8x8xf32>
    %25 = arith.subf %21, %24 : vector<2x8x8xf32>
    %26 = math.exp %25 : vector<2x8x8xf32>
    %cst_18 = arith.constant dense<0.000000e+00> : vector<2x8xf32>
    %27 = vector.multi_reduction <add>, %26, %cst_18 [2] : vector<2x8x8xf32> to vector<2x8xf32>
    %28 = vector.shape_cast %27 : vector<2x8xf32> to vector<2x8x1xf32>
    %29 = tpu.reciprocal %28 {approx = true} : vector<2x8x1xf32> -> vector<2x8x1xf32>
    %30 = vector.broadcast %29 : vector<2x8x1xf32> to vector<2x8x8xf32>
    %31 = arith.mulf %26, %30 : vector<2x8x8xf32>
    "tpu.trace_start"() <{level = 10 : i32, message = "nqk,nkd->nqd"}> : () -> ()
    %cst_19 = arith.constant dense<0.000000e+00> : vector<2x8x8xf32>
    %32 = tpu.matmul %31, %18, %cst_19 {dimension_numbers = #tpu.dot_dimension_numbers<[2], [1], [1], [2], [0, 0, 0, 1, 1, 2], [0], [0]>} : vector<2x8x8xf32>, vector<2x8x8xf32>, vector<2x8x8xf32> -> vector<2x8x8xf32>
    "tpu.trace_stop"() : () -> ()
    %33 = vector.extract_strided_slice %17 {offsets = [0, 0, 8], sizes = [2, 8, 8], strides = [1, 1, 1]} : vector<2x8x32xf32> to vector<2x8x8xf32>
    %cst_20 = arith.constant 0.353553385 : f32
    %34 = vector.broadcast %cst_20 : f32 to vector<2x8x8xf32>
    %35 = arith.mulf %33, %34 : vector<2x8x8xf32>
    "tpu.trace_start"() <{level = 10 : i32, message = "nqd,nkd->nqk"}> : () -> ()
    %cst_21 = arith.constant dense<0.000000e+00> : vector<2x8x8xf32>
    %36 = tpu.matmul %35, %33, %cst_21 {dimension_numbers = #tpu.dot_dimension_numbers<[2], [2], [1], [1], [0, 0, 0, 1, 1, 1], [0], [0]>} : vector<2x8x8xf32>, vector<2x8x8xf32>, vector<2x8x8xf32> -> vector<2x8x8xf32>
    "tpu.trace_stop"() : () -> ()
    %cst_22 = arith.constant dense<0xFF800000> : vector<2x8xf32>
    %37 = vector.multi_reduction <maximumf>, %36, %cst_22 [2] : vector<2x8x8xf32> to vector<2x8xf32>
    %38 = vector.shape_cast %37 : vector<2x8xf32> to vector<2x8x1xf32>
    %39 = vector.broadcast %38 : vector<2x8x1xf32> to vector<2x8x8xf32>
    %40 = arith.subf %36, %39 : vector<2x8x8xf32>
    %41 = math.exp %40 : vector<2x8x8xf32>
    %cst_23 = arith.constant dense<0.000000e+00> : vector<2x8xf32>
    %42 = vector.multi_reduction <add>, %41, %cst_23 [2] : vector<2x8x8xf32> to vector<2x8xf32>
    %43 = vector.shape_cast %42 : vector<2x8xf32> to vector<2x8x1xf32>
    %44 = tpu.reciprocal %43 {approx = true} : vector<2x8x1xf32> -> vector<2x8x1xf32>
    %45 = vector.broadcast %44 : vector<2x8x1xf32> to vector<2x8x8xf32>
    %46 = arith.mulf %41, %45 : vector<2x8x8xf32>
    "tpu.trace_start"() <{level = 10 : i32, message = "nqk,nkd->nqd"}> : () -> ()
    %cst_24 = arith.constant dense<0.000000e+00> : vector<2x8x8xf32>
    %47 = tpu.matmul %46, %33, %cst_24 {dimension_numbers = #tpu.dot_dimension_numbers<[2], [1], [1], [2], [0, 0, 0, 1, 1, 2], [0], [0]>} : vector<2x8x8xf32>, vector<2x8x8xf32>, vector<2x8x8xf32> -> vector<2x8x8xf32>
    "tpu.trace_stop"() : () -> ()
    %48 = vector.extract_strided_slice %17 {offsets = [0, 0, 16], sizes = [2, 8, 8], strides = [1, 1, 1]} : vector<2x8x32xf32> to vector<2x8x8xf32>
    %cst_25 = arith.constant 0.353553385 : f32
    %49 = vector.broadcast %cst_25 : f32 to vector<2x8x8xf32>
    %50 = arith.mulf %48, %49 : vector<2x8x8xf32>
    "tpu.trace_start"() <{level = 10 : i32, message = "nqd,nkd->nqk"}> : () -> ()
    %cst_26 = arith.constant dense<0.000000e+00> : vector<2x8x8xf32>
    %51 = tpu.matmul %50, %48, %cst_26 {dimension_numbers = #tpu.dot_dimension_numbers<[2], [2], [1], [1], [0, 0, 0, 1, 1, 1], [0], [0]>} : vector<2x8x8xf32>, vector<2x8x8xf32>, vector<2x8x8xf32> -> vector<2x8x8xf32>
    "tpu.trace_stop"() : () -> ()
    %cst_27 = arith.constant dense<0xFF800000> : vector<2x8xf32>
    %52 = vector.multi_reduction <maximumf>, %51, %cst_27 [2] : vector<2x8x8xf32> to vector<2x8xf32>
    %53 = vector.shape_cast %52 : vector<2x8xf32> to vector<2x8x1xf32>
    %54 = vector.broadcast %53 : vector<2x8x1xf32> to vector<2x8x8xf32>
    %55 = arith.subf %51, %54 : vector<2x8x8xf32>
    %56 = math.exp %55 : vector<2x8x8xf32>
    %cst_28 = arith.constant dense<0.000000e+00> : vector<2x8xf32>
    %57 = vector.multi_reduction <add>, %56, %cst_28 [2] : vector<2x8x8xf32> to vector<2x8xf32>
    %58 = vector.shape_cast %57 : vector<2x8xf32> to vector<2x8x1xf32>
    %59 = tpu.reciprocal %58 {approx = true} : vector<2x8x1xf32> -> vector<2x8x1xf32>
    %60 = vector.broadcast %59 : vector<2x8x1xf32> to vector<2x8x8xf32>
    %61 = arith.mulf %56, %60 : vector<2x8x8xf32>
    "tpu.trace_start"() <{level = 10 : i32, message = "nqk,nkd->nqd"}> : () -> ()
    %cst_29 = arith.constant dense<0.000000e+00> : vector<2x8x8xf32>
    %62 = tpu.matmul %61, %48, %cst_29 {dimension_numbers = #tpu.dot_dimension_numbers<[2], [1], [1], [2], [0, 0, 0, 1, 1, 2], [0], [0]>} : vector<2x8x8xf32>, vector<2x8x8xf32>, vector<2x8x8xf32> -> vector<2x8x8xf32>
    "tpu.trace_stop"() : () -> ()
    %63 = vector.extract_strided_slice %17 {offsets = [0, 0, 24], sizes = [2, 8, 8], strides = [1, 1, 1]} : vector<2x8x32xf32> to vector<2x8x8xf32>
    %cst_30 = arith.constant 0.353553385 : f32
    %64 = vector.broadcast %cst_30 : f32 to vector<2x8x8xf32>
    %65 = arith.mulf %63, %64 : vector<2x8x8xf32>
    "tpu.trace_start"() <{level = 10 : i32, message = "nqd,nkd->nqk"}> : () -> ()
    %cst_31 = arith.constant dense<0.000000e+00> : vector<2x8x8xf32>
    %66 = tpu.matmul %65, %63, %cst_31 {dimension_numbers = #tpu.dot_dimension_numbers<[2], [2], [1], [1], [0, 0, 0, 1, 1, 1], [0], [0]>} : vector<2x8x8xf32>, vector<2x8x8xf32>, vector<2x8x8xf32> -> vector<2x8x8xf32>
    "tpu.trace_stop"() : () -> ()
    %cst_32 = arith.constant dense<0xFF800000> : vector<2x8xf32>
    %67 = vector.multi_reduction <maximumf>, %66, %cst_32 [2] : vector<2x8x8xf32> to vector<2x8xf32>
    %68 = vector.shape_cast %67 : vector<2x8xf32> to vector<2x8x1xf32>
    %69 = vector.broadcast %68 : vector<2x8x1xf32> to vector<2x8x8xf32>
    %70 = arith.subf %66, %69 : vector<2x8x8xf32>
    %71 = math.exp %70 : vector<2x8x8xf32>
    %cst_33 = arith.constant dense<0.000000e+00> : vector<2x8xf32>
    %72 = vector.multi_reduction <add>, %71, %cst_33 [2] : vector<2x8x8xf32> to vector<2x8xf32>
    %73 = vector.shape_cast %72 : vector<2x8xf32> to vector<2x8x1xf32>
    %74 = tpu.reciprocal %73 {approx = true} : vector<2x8x1xf32> -> vector<2x8x1xf32>
    %75 = vector.broadcast %74 : vector<2x8x1xf32> to vector<2x8x8xf32>
    %76 = arith.mulf %71, %75 : vector<2x8x8xf32>
    "tpu.trace_start"() <{level = 10 : i32, message = "nqk,nkd->nqd"}> : () -> ()
    %cst_34 = arith.constant dense<0.000000e+00> : vector<2x8x8xf32>
    %77 = tpu.matmul %76, %63, %cst_34 {dimension_numbers = #tpu.dot_dimension_numbers<[2], [1], [1], [2], [0, 0, 0, 1, 1, 2], [0], [0]>} : vector<2x8x8xf32>, vector<2x8x8xf32>, vector<2x8x8xf32> -> vector<2x8x8xf32>
    "tpu.trace_stop"() : () -> ()
    %78 = tpu.concatenate %32, %47, %62, %77 in 2 : vector<2x8x8xf32>, vector<2x8x8xf32>, vector<2x8x8xf32>, vector<2x8x8xf32> -> vector<2x8x32xf32>
    %79 = vector.shape_cast %78 : vector<2x8x32xf32> to vector<16x32xf32>
    %80 = arith.truncf %79 : vector<16x32xf32> to vector<16x32xbf16>
    %cst_35 = arith.constant dense<0.000000e+00> : vector<16x32xf32>
    %81 = tpu.matmul %80, %2, %cst_35 {dimension_numbers = #tpu.dot_dimension_numbers<[1], [0], [0], [1], [0, 0, 1, 1], [], []>} : vector<16x32xbf16>, vector<32x32xbf16>, vector<16x32xf32> -> vector<16x32xf32>
    %82 = vector.broadcast %11 : vector<1x32xf32> to vector<16x32xf32>
    %83 = arith.addf %81, %82 : vector<16x32xf32>
    %84 = arith.addf %83, %0 : vector<16x32xf32>
    %cst_36 = arith.constant dense<0.000000e+00> : vector<16xf32>
    %85 = vector.multi_reduction <add>, %84, %cst_36 [1] : vector<16x32xf32> to vector<16xf32>
    %86 = vector.shape_cast %85 : vector<16xf32> to vector<16x1xf32>
    %cst_37 = arith.constant 3.200000e+01 : f32
    %87 = vector.broadcast %cst_37 : f32 to vector<16x1xf32>
    %88 = arith.divf %86, %87 : vector<16x1xf32>
    %89 = vector.broadcast %88 : vector<16x1xf32> to vector<16x32xf32>
    %90 = arith.subf %84, %89 : vector<16x32xf32>
    %91 = arith.mulf %90, %90 : vector<16x32xf32>
    %cst_38 = arith.constant dense<0.000000e+00> : vector<16xf32>
    %92 = vector.multi_reduction <add>, %91, %cst_38 [1] : vector<16x32xf32> to vector<16xf32>
    %93 = vector.shape_cast %92 : vector<16xf32> to vector<16x1xf32>
    %cst_39 = arith.constant 3.200000e+01 : f32
    %94 = vector.broadcast %cst_39 : f32 to vector<16x1xf32>
    %95 = arith.divf %93, %94 : vector<16x1xf32>
    %cst_40 = arith.constant 9.99999997E-7 : f32
    %96 = vector.broadcast %cst_40 : f32 to vector<16x1xf32>
    %97 = arith.addf %95, %96 : vector<16x1xf32>
    %98 = math.rsqrt %97 : vector<16x1xf32>
    %99 = vector.broadcast %98 : vector<16x1xf32> to vector<16x32xf32>
    %100 = arith.mulf %90, %99 : vector<16x32xf32>
    %101 = vector.broadcast %12 : vector<1x32xf32> to vector<16x32xf32>
    %102 = arith.mulf %101, %100 : vector<16x32xf32>
    %103 = vector.broadcast %13 : vector<1x32xf32> to vector<16x32xf32>
    %104 = arith.addf %102, %103 : vector<16x32xf32>
    %105 = arith.truncf %104 : vector<16x32xf32> to vector<16x32xbf16>
    %cst_41 = arith.constant dense<0.000000e+00> : vector<16x128xf32>
    %106 = tpu.matmul %105, %4, %cst_41 {dimension_numbers = #tpu.dot_dimension_numbers<[1], [0], [0], [1], [0, 0, 1, 1], [], []>} : vector<16x32xbf16>, vector<32x128xbf16>, vector<16x128xf32> -> vector<16x128xf32>
    %107 = vector.broadcast %10 : vector<1x128xf32> to vector<16x128xf32>
    %108 = arith.addf %106, %107 : vector<16x128xf32>
    %cst_42 = arith.constant 0.000000e+00 : f32
    %109 = vector.broadcast %cst_42 : f32 to vector<16x128xf32>
    %110 = arith.maximumf %108, %109 : vector<16x128xf32>
    %111 = arith.truncf %110 : vector<16x128xf32> to vector<16x128xbf16>
    %cst_43 = arith.constant dense<0.000000e+00> : vector<16x32xf32>
    %112 = tpu.matmul %111, %6, %cst_43 {dimension_numbers = #tpu.dot_dimension_numbers<[1], [1], [0], [0], [0, 0, 1, 0], [], []>} : vector<16x128xbf16>, vector<32x128xbf16>, vector<16x32xf32> -> vector<16x32xf32>
    %113 = vector.broadcast %16 : vector<1x32xf32> to vector<16x32xf32>
    %114 = arith.addf %112, %113 : vector<16x32xf32>
    %115 = arith.addf %114, %104 : vector<16x32xf32>
    %cst_44 = arith.constant dense<0.000000e+00> : vector<16xf32>
    %116 = vector.multi_reduction <add>, %115, %cst_44 [1] : vector<16x32xf32> to vector<16xf32>
    %117 = vector.shape_cast %116 : vector<16xf32> to vector<16x1xf32>
    %cst_45 = arith.constant 3.200000e+01 : f32
    %118 = vector.broadcast %cst_45 : f32 to vector<16x1xf32>
    %119 = arith.divf %117, %118 : vector<16x1xf32>
    %120 = vector.broadcast %119 : vector<16x1xf32> to vector<16x32xf32>
    %121 = arith.subf %115, %120 : vector<16x32xf32>
    %122 = arith.mulf %121, %121 : vector<16x32xf32>
    %cst_46 = arith.constant dense<0.000000e+00> : vector<16xf32>
    %123 = vector.multi_reduction <add>, %122, %cst_46 [1] : vector<16x32xf32> to vector<16xf32>
    %124 = vector.shape_cast %123 : vector<16xf32> to vector<16x1xf32>
    %cst_47 = arith.constant 3.200000e+01 : f32
    %125 = vector.broadcast %cst_47 : f32 to vector<16x1xf32>
    %126 = arith.divf %124, %125 : vector<16x1xf32>
    %cst_48 = arith.constant 9.99999997E-7 : f32
    %127 = vector.broadcast %cst_48 : f32 to vector<16x1xf32>
    %128 = arith.addf %126, %127 : vector<16x1xf32>
    %129 = math.rsqrt %128 : vector<16x1xf32>
    %130 = vector.broadcast %129 : vector<16x1xf32> to vector<16x32xf32>
    %131 = arith.mulf %121, %130 : vector<16x32xf32>
    %132 = vector.broadcast %14 : vector<1x32xf32> to vector<16x32xf32>
    %133 = arith.mulf %132, %131 : vector<16x32xf32>
    %134 = vector.broadcast %15 : vector<1x32xf32> to vector<16x32xf32>
    %135 = arith.addf %133, %134 : vector<16x32xf32>
    %c1 = arith.constant 1 : index
    %c0_49 = arith.constant 0 : index
    %c0_50 = arith.constant 0 : index
    %136 = vector.load %arg1[%c1, %c0_49, %c0_50] : memref<2x32x32xbf16, #tpu.memory_space<vmem>>, vector<1x32x32xbf16>
    %137 = vector.shape_cast %136 : vector<1x32x32xbf16> to vector<32x32xbf16>
    %c1_51 = arith.constant 1 : index
    %c0_52 = arith.constant 0 : index
    %c0_53 = arith.constant 0 : index
    %138 = vector.load %arg2[%c1_51, %c0_52, %c0_53] : memref<2x32x128xbf16, #tpu.memory_space<vmem>>, vector<1x32x128xbf16>
    %139 = vector.shape_cast %138 : vector<1x32x128xbf16> to vector<32x128xbf16>
    %c1_54 = arith.constant 1 : index
    %c0_55 = arith.constant 0 : index
    %c0_56 = arith.constant 0 : index
    %140 = vector.load %arg3[%c1_54, %c0_55, %c0_56] : memref<2x32x128xbf16, #tpu.memory_space<vmem>>, vector<1x32x128xbf16>
    %141 = vector.shape_cast %140 : vector<1x32x128xbf16> to vector<32x128xbf16>
    %c1_57 = arith.constant 1 : index
    %c0_58 = arith.constant 0 : index
    %c0_59 = arith.constant 0 : index
    %142 = vector.load %arg4[%c1_57, %c0_58, %c0_59] : memref<2x6x32xf32, #tpu.memory_space<vmem>>, vector<1x6x32xf32>
    %143 = vector.shape_cast %142 : vector<1x6x32xf32> to vector<6x32xf32>
    %c1_60 = arith.constant 1 : index
    %c0_61 = arith.constant 0 : index
    %c0_62 = arith.constant 0 : index
    %144 = vector.load %arg5[%c1_60, %c0_61, %c0_62] : memref<2x1x128xf32, #tpu.memory_space<vmem>>, vector<1x1x128xf32>
    %145 = vector.shape_cast %144 : vector<1x1x128xf32> to vector<1x128xf32>
    %146 = vector.extract_strided_slice %143 {offsets = [0, 0], sizes = [1, 32], strides = [1, 1]} : vector<6x32xf32> to vector<1x32xf32>
    %147 = vector.extract_strided_slice %143 {offsets = [1, 0], sizes = [1, 32], strides = [1, 1]} : vector<6x32xf32> to vector<1x32xf32>
    %148 = vector.extract_strided_slice %143 {offsets = [2, 0], sizes = [1, 32], strides = [1, 1]} : vector<6x32xf32> to vector<1x32xf32>
    %149 = vector.extract_strided_slice %143 {offsets = [3, 0], sizes = [1, 32], strides = [1, 1]} : vector<6x32xf32> to vector<1x32xf32>
    %150 = vector.extract_strided_slice %143 {offsets = [4, 0], sizes = [1, 32], strides = [1, 1]} : vector<6x32xf32> to vector<1x32xf32>
    %151 = vector.extract_strided_slice %143 {offsets = [5, 0], sizes = [1, 32], strides = [1, 1]} : vector<6x32xf32> to vector<1x32xf32>
    %152 = vector.shape_cast %135 : vector<16x32xf32> to vector<2x8x32xf32>
    %153 = vector.extract_strided_slice %152 {offsets = [0, 0, 0], sizes = [2, 8, 8], strides = [1, 1, 1]} : vector<2x8x32xf32> to vector<2x8x8xf32>
    %cst_63 = arith.constant 0.353553385 : f32
    %154 = vector.broadcast %cst_63 : f32 to vector<2x8x8xf32>
    %155 = arith.mulf %153, %154 : vector<2x8x8xf32>
    "tpu.trace_start"() <{level = 10 : i32, message = "nqd,nkd->nqk"}> : () -> ()
    %cst_64 = arith.constant dense<0.000000e+00> : vector<2x8x8xf32>
    %156 = tpu.matmul %155, %153, %cst_64 {dimension_numbers = #tpu.dot_dimension_numbers<[2], [2], [1], [1], [0, 0, 0, 1, 1, 1], [0], [0]>} : vector<2x8x8xf32>, vector<2x8x8xf32>, vector<2x8x8xf32> -> vector<2x8x8xf32>
    "tpu.trace_stop"() : () -> ()
    %cst_65 = arith.constant dense<0xFF800000> : vector<2x8xf32>
    %157 = vector.multi_reduction <maximumf>, %156, %cst_65 [2] : vector<2x8x8xf32> to vector<2x8xf32>
    %158 = vector.shape_cast %157 : vector<2x8xf32> to vector<2x8x1xf32>
    %159 = vector.broadcast %158 : vector<2x8x1xf32> to vector<2x8x8xf32>
    %160 = arith.subf %156, %159 : vector<2x8x8xf32>
    %161 = math.exp %160 : vector<2x8x8xf32>
    %cst_66 = arith.constant dense<0.000000e+00> : vector<2x8xf32>
    %162 = vector.multi_reduction <add>, %161, %cst_66 [2] : vector<2x8x8xf32> to vector<2x8xf32>
    %163 = vector.shape_cast %162 : vector<2x8xf32> to vector<2x8x1xf32>
    %164 = tpu.reciprocal %163 {approx = true} : vector<2x8x1xf32> -> vector<2x8x1xf32>
    %165 = vector.broadcast %164 : vector<2x8x1xf32> to vector<2x8x8xf32>
    %166 = arith.mulf %161, %165 : vector<2x8x8xf32>
    "tpu.trace_start"() <{level = 10 : i32, message = "nqk,nkd->nqd"}> : () -> ()
    %cst_67 = arith.constant dense<0.000000e+00> : vector<2x8x8xf32>
    %167 = tpu.matmul %166, %153, %cst_67 {dimension_numbers = #tpu.dot_dimension_numbers<[2], [1], [1], [2], [0, 0, 0, 1, 1, 2], [0], [0]>} : vector<2x8x8xf32>, vector<2x8x8xf32>, vector<2x8x8xf32> -> vector<2x8x8xf32>
    "tpu.trace_stop"() : () -> ()
    %168 = vector.extract_strided_slice %152 {offsets = [0, 0, 8], sizes = [2, 8, 8], strides = [1, 1, 1]} : vector<2x8x32xf32> to vector<2x8x8xf32>
    %cst_68 = arith.constant 0.353553385 : f32
    %169 = vector.broadcast %cst_68 : f32 to vector<2x8x8xf32>
    %170 = arith.mulf %168, %169 : vector<2x8x8xf32>
    "tpu.trace_start"() <{level = 10 : i32, message = "nqd,nkd->nqk"}> : () -> ()
    %cst_69 = arith.constant dense<0.000000e+00> : vector<2x8x8xf32>
    %171 = tpu.matmul %170, %168, %cst_69 {dimension_numbers = #tpu.dot_dimension_numbers<[2], [2], [1], [1], [0, 0, 0, 1, 1, 1], [0], [0]>} : vector<2x8x8xf32>, vector<2x8x8xf32>, vector<2x8x8xf32> -> vector<2x8x8xf32>
    "tpu.trace_stop"() : () -> ()
    %cst_70 = arith.constant dense<0xFF800000> : vector<2x8xf32>
    %172 = vector.multi_reduction <maximumf>, %171, %cst_70 [2] : vector<2x8x8xf32> to vector<2x8xf32>
    %173 = vector.shape_cast %172 : vector<2x8xf32> to vector<2x8x1xf32>
    %174 = vector.broadcast %173 : vector<2x8x1xf32> to vector<2x8x8xf32>
    %175 = arith.subf %171, %174 : vector<2x8x8xf32>
    %176 = math.exp %175 : vector<2x8x8xf32>
    %cst_71 = arith.constant dense<0.000000e+00> : vector<2x8xf32>
    %177 = vector.multi_reduction <add>, %176, %cst_71 [2] : vector<2x8x8xf32> to vector<2x8xf32>
    %178 = vector.shape_cast %177 : vector<2x8xf32> to vector<2x8x1xf32>
    %179 = tpu.reciprocal %178 {approx = true} : vector<2x8x1xf32> -> vector<2x8x1xf32>
    %180 = vector.broadcast %179 : vector<2x8x1xf32> to vector<2x8x8xf32>
    %181 = arith.mulf %176, %180 : vector<2x8x8xf32>
    "tpu.trace_start"() <{level = 10 : i32, message = "nqk,nkd->nqd"}> : () -> ()
    %cst_72 = arith.constant dense<0.000000e+00> : vector<2x8x8xf32>
    %182 = tpu.matmul %181, %168, %cst_72 {dimension_numbers = #tpu.dot_dimension_numbers<[2], [1], [1], [2], [0, 0, 0, 1, 1, 2], [0], [0]>} : vector<2x8x8xf32>, vector<2x8x8xf32>, vector<2x8x8xf32> -> vector<2x8x8xf32>
    "tpu.trace_stop"() : () -> ()
    %183 = vector.extract_strided_slice %152 {offsets = [0, 0, 16], sizes = [2, 8, 8], strides = [1, 1, 1]} : vector<2x8x32xf32> to vector<2x8x8xf32>
    %cst_73 = arith.constant 0.353553385 : f32
    %184 = vector.broadcast %cst_73 : f32 to vector<2x8x8xf32>
    %185 = arith.mulf %183, %184 : vector<2x8x8xf32>
    "tpu.trace_start"() <{level = 10 : i32, message = "nqd,nkd->nqk"}> : () -> ()
    %cst_74 = arith.constant dense<0.000000e+00> : vector<2x8x8xf32>
    %186 = tpu.matmul %185, %183, %cst_74 {dimension_numbers = #tpu.dot_dimension_numbers<[2], [2], [1], [1], [0, 0, 0, 1, 1, 1], [0], [0]>} : vector<2x8x8xf32>, vector<2x8x8xf32>, vector<2x8x8xf32> -> vector<2x8x8xf32>
    "tpu.trace_stop"() : () -> ()
    %cst_75 = arith.constant dense<0xFF800000> : vector<2x8xf32>
    %187 = vector.multi_reduction <maximumf>, %186, %cst_75 [2] : vector<2x8x8xf32> to vector<2x8xf32>
    %188 = vector.shape_cast %187 : vector<2x8xf32> to vector<2x8x1xf32>
    %189 = vector.broadcast %188 : vector<2x8x1xf32> to vector<2x8x8xf32>
    %190 = arith.subf %186, %189 : vector<2x8x8xf32>
    %191 = math.exp %190 : vector<2x8x8xf32>
    %cst_76 = arith.constant dense<0.000000e+00> : vector<2x8xf32>
    %192 = vector.multi_reduction <add>, %191, %cst_76 [2] : vector<2x8x8xf32> to vector<2x8xf32>
    %193 = vector.shape_cast %192 : vector<2x8xf32> to vector<2x8x1xf32>
    %194 = tpu.reciprocal %193 {approx = true} : vector<2x8x1xf32> -> vector<2x8x1xf32>
    %195 = vector.broadcast %194 : vector<2x8x1xf32> to vector<2x8x8xf32>
    %196 = arith.mulf %191, %195 : vector<2x8x8xf32>
    "tpu.trace_start"() <{level = 10 : i32, message = "nqk,nkd->nqd"}> : () -> ()
    %cst_77 = arith.constant dense<0.000000e+00> : vector<2x8x8xf32>
    %197 = tpu.matmul %196, %183, %cst_77 {dimension_numbers = #tpu.dot_dimension_numbers<[2], [1], [1], [2], [0, 0, 0, 1, 1, 2], [0], [0]>} : vector<2x8x8xf32>, vector<2x8x8xf32>, vector<2x8x8xf32> -> vector<2x8x8xf32>
    "tpu.trace_stop"() : () -> ()
    %198 = vector.extract_strided_slice %152 {offsets = [0, 0, 24], sizes = [2, 8, 8], strides = [1, 1, 1]} : vector<2x8x32xf32> to vector<2x8x8xf32>
    %cst_78 = arith.constant 0.353553385 : f32
    %199 = vector.broadcast %cst_78 : f32 to vector<2x8x8xf32>
    %200 = arith.mulf %198, %199 : vector<2x8x8xf32>
    "tpu.trace_start"() <{level = 10 : i32, message = "nqd,nkd->nqk"}> : () -> ()
    %cst_79 = arith.constant dense<0.000000e+00> : vector<2x8x8xf32>
    %201 = tpu.matmul %200, %198, %cst_79 {dimension_numbers = #tpu.dot_dimension_numbers<[2], [2], [1], [1], [0, 0, 0, 1, 1, 1], [0], [0]>} : vector<2x8x8xf32>, vector<2x8x8xf32>, vector<2x8x8xf32> -> vector<2x8x8xf32>
    "tpu.trace_stop"() : () -> ()
    %cst_80 = arith.constant dense<0xFF800000> : vector<2x8xf32>
    %202 = vector.multi_reduction <maximumf>, %201, %cst_80 [2] : vector<2x8x8xf32> to vector<2x8xf32>
    %203 = vector.shape_cast %202 : vector<2x8xf32> to vector<2x8x1xf32>
    %204 = vector.broadcast %203 : vector<2x8x1xf32> to vector<2x8x8xf32>
    %205 = arith.subf %201, %204 : vector<2x8x8xf32>
    %206 = math.exp %205 : vector<2x8x8xf32>
    %cst_81 = arith.constant dense<0.000000e+00> : vector<2x8xf32>
    %207 = vector.multi_reduction <add>, %206, %cst_81 [2] : vector<2x8x8xf32> to vector<2x8xf32>
    %208 = vector.shape_cast %207 : vector<2x8xf32> to vector<2x8x1xf32>
    %209 = tpu.reciprocal %208 {approx = true} : vector<2x8x1xf32> -> vector<2x8x1xf32>
    %210 = vector.broadcast %209 : vector<2x8x1xf32> to vector<2x8x8xf32>
    %211 = arith.mulf %206, %210 : vector<2x8x8xf32>
    "tpu.trace_start"() <{level = 10 : i32, message = "nqk,nkd->nqd"}> : () -> ()
    %cst_82 = arith.constant dense<0.000000e+00> : vector<2x8x8xf32>
    %212 = tpu.matmul %211, %198, %cst_82 {dimension_numbers = #tpu.dot_dimension_numbers<[2], [1], [1], [2], [0, 0, 0, 1, 1, 2], [0], [0]>} : vector<2x8x8xf32>, vector<2x8x8xf32>, vector<2x8x8xf32> -> vector<2x8x8xf32>
    "tpu.trace_stop"() : () -> ()
    %213 = tpu.concatenate %167, %182, %197, %212 in 2 : vector<2x8x8xf32>, vector<2x8x8xf32>, vector<2x8x8xf32>, vector<2x8x8xf32> -> vector<2x8x32xf32>
    %214 = vector.shape_cast %213 : vector<2x8x32xf32> to vector<16x32xf32>
    %215 = arith.truncf %214 : vector<16x32xf32> to vector<16x32xbf16>
    %cst_83 = arith.constant dense<0.000000e+00> : vector<16x32xf32>
    %216 = tpu.matmul %215, %137, %cst_83 {dimension_numbers = #tpu.dot_dimension_numbers<[1], [0], [0], [1], [0, 0, 1, 1], [], []>} : vector<16x32xbf16>, vector<32x32xbf16>, vector<16x32xf32> -> vector<16x32xf32>
    %217 = vector.broadcast %146 : vector<1x32xf32> to vector<16x32xf32>
    %218 = arith.addf %216, %217 : vector<16x32xf32>
    %219 = arith.addf %218, %135 : vector<16x32xf32>
    %cst_84 = arith.constant dense<0.000000e+00> : vector<16xf32>
    %220 = vector.multi_reduction <add>, %219, %cst_84 [1] : vector<16x32xf32> to vector<16xf32>
    %221 = vector.shape_cast %220 : vector<16xf32> to vector<16x1xf32>
    %cst_85 = arith.constant 3.200000e+01 : f32
    %222 = vector.broadcast %cst_85 : f32 to vector<16x1xf32>
    %223 = arith.divf %221, %222 : vector<16x1xf32>
    %224 = vector.broadcast %223 : vector<16x1xf32> to vector<16x32xf32>
    %225 = arith.subf %219, %224 : vector<16x32xf32>
    %226 = arith.mulf %225, %225 : vector<16x32xf32>
    %cst_86 = arith.constant dense<0.000000e+00> : vector<16xf32>
    %227 = vector.multi_reduction <add>, %226, %cst_86 [1] : vector<16x32xf32> to vector<16xf32>
    %228 = vector.shape_cast %227 : vector<16xf32> to vector<16x1xf32>
    %cst_87 = arith.constant 3.200000e+01 : f32
    %229 = vector.broadcast %cst_87 : f32 to vector<16x1xf32>
    %230 = arith.divf %228, %229 : vector<16x1xf32>
    %cst_88 = arith.constant 9.99999997E-7 : f32
    %231 = vector.broadcast %cst_88 : f32 to vector<16x1xf32>
    %232 = arith.addf %230, %231 : vector<16x1xf32>
    %233 = math.rsqrt %232 : vector<16x1xf32>
    %234 = vector.broadcast %233 : vector<16x1xf32> to vector<16x32xf32>
    %235 = arith.mulf %225, %234 : vector<16x32xf32>
    %236 = vector.broadcast %147 : vector<1x32xf32> to vector<16x32xf32>
    %237 = arith.mulf %236, %235 : vector<16x32xf32>
    %238 = vector.broadcast %148 : vector<1x32xf32> to vector<16x32xf32>
    %239 = arith.addf %237, %238 : vector<16x32xf32>
    %240 = arith.truncf %239 : vector<16x32xf32> to vector<16x32xbf16>
    %cst_89 = arith.constant dense<0.000000e+00> : vector<16x128xf32>
    %241 = tpu.matmul %240, %139, %cst_89 {dimension_numbers = #tpu.dot_dimension_numbers<[1], [0], [0], [1], [0, 0, 1, 1], [], []>} : vector<16x32xbf16>, vector<32x128xbf16>, vector<16x128xf32> -> vector<16x128xf32>
    %242 = vector.broadcast %145 : vector<1x128xf32> to vector<16x128xf32>
    %243 = arith.addf %241, %242 : vector<16x128xf32>
    %cst_90 = arith.constant 0.000000e+00 : f32
    %244 = vector.broadcast %cst_90 : f32 to vector<16x128xf32>
    %245 = arith.maximumf %243, %244 : vector<16x128xf32>
    %246 = arith.truncf %245 : vector<16x128xf32> to vector<16x128xbf16>
    %cst_91 = arith.constant dense<0.000000e+00> : vector<16x32xf32>
    %247 = tpu.matmul %246, %141, %cst_91 {dimension_numbers = #tpu.dot_dimension_numbers<[1], [1], [0], [0], [0, 0, 1, 0], [], []>} : vector<16x128xbf16>, vector<32x128xbf16>, vector<16x32xf32> -> vector<16x32xf32>
    %248 = vector.broadcast %151 : vector<1x32xf32> to vector<16x32xf32>
    %249 = arith.addf %247, %248 : vector<16x32xf32>
    %250 = arith.addf %249, %239 : vector<16x32xf32>
    %cst_92 = arith.constant dense<0.000000e+00> : vector<16xf32>
    %251 = vector.multi_reduction <add>, %250, %cst_92 [1] : vector<16x32xf32> to vector<16xf32>
    %252 = vector.shape_cast %251 : vector<16xf32> to vector<16x1xf32>
    %cst_93 = arith.constant 3.200000e+01 : f32
    %253 = vector.broadcast %cst_93 : f32 to vector<16x1xf32>
    %254 = arith.divf %252, %253 : vector<16x1xf32>
    %255 = vector.broadcast %254 : vector<16x1xf32> to vector<16x32xf32>
    %256 = arith.subf %250, %255 : vector<16x32xf32>
    %257 = arith.mulf %256, %256 : vector<16x32xf32>
    %cst_94 = arith.constant dense<0.000000e+00> : vector<16xf32>
    %258 = vector.multi_reduction <add>, %257, %cst_94 [1] : vector<16x32xf32> to vector<16xf32>
    %259 = vector.shape_cast %258 : vector<16xf32> to vector<16x1xf32>
    %cst_95 = arith.constant 3.200000e+01 : f32
    %260 = vector.broadcast %cst_95 : f32 to vector<16x1xf32>
    %261 = arith.divf %259, %260 : vector<16x1xf32>
    %cst_96 = arith.constant 9.99999997E-7 : f32
    %262 = vector.broadcast %cst_96 : f32 to vector<16x1xf32>
    %263 = arith.addf %261, %262 : vector<16x1xf32>
    %264 = math.rsqrt %263 : vector<16x1xf32>
    %265 = vector.broadcast %264 : vector<16x1xf32> to vector<16x32xf32>
    %266 = arith.mulf %256, %265 : vector<16x32xf32>
    %267 = vector.broadcast %149 : vector<1x32xf32> to vector<16x32xf32>
    %268 = arith.mulf %267, %266 : vector<16x32xf32>
    %269 = vector.broadcast %150 : vector<1x32xf32> to vector<16x32xf32>
    %270 = arith.addf %268, %269 : vector<16x32xf32>
    %c0_97 = arith.constant 0 : index
    %c0_98 = arith.constant 0 : index
    %271 = vector.load %arg6[%c0_97, %c0_98] : memref<16x32xf32, #tpu.memory_space<vmem>>, vector<16x32xf32>
    tpu.vector_store %arg6[%c0_97, %c0_98], %270 {strides = array<i32>} : memref<16x32xf32, #tpu.memory_space<vmem>>, vector<16x32xf32>,
    return
  }
}

</mosaic_0001>

<bundles_post_ra>
// kernel: tpu_custom_call.1
= control target key start
LH: loop header
LB: loop body
LE: loop exit
PB: predicated region body
PF: predicated region fallthrough
CT: control target
= control target key end

     0   :  { %11 = vsyncpa [#allocation3], 0  ;;  %s4387_s0 = inlined_call_operand.hbm [shape: f32[16,32], index: 0, kind: input, shape index: {}]   ;;  %s4388_s1 = inlined_call_operand.hbm [shape: bf16[2,32,32], index: 1, kind: input, shape index: {}]   ;;  %s4389_s2 = inlined_call_operand.hbm [shape: bf16[2,32,128], index: 2, kind: input, shape index: {}]   ;;  %s4390_s3 = inlined_call_operand.vmem [shape: bf16[2,32,128], index: 3, kind: input, shape index: {}]   ;;  %s4391_s4 = inlined_call_operand.vmem [shape: f32[2,6,32], index: 4, kind: input, shape index: {}]   ;;  %s4392_s5 = inlined_call_operand.vmem [shape: f32[2,1,128], index: 5, kind: input, shape index: {}]   ;;  %s4393_s6 = inlined_call_operand.hbm [shape: f32[16,32], index: 6, kind: output, shape index: {}]  }
   0x1   :  { %12 = vsyncpa [#allocation6], 0 }
   0x2   :  { %13 = vsyncpa [#allocation4], 0  ;;  %s3899_s21 = smov [#allocation5]  }
   0x3   :  { %s31_s22 = sshll.u32 %s3899_s21, 4  ;;  %s32_s22 = int_to_ptr.vmem [resolvable:$true] %s31_s22 }
   0x4   :  { %s3821_s23 = scalar_lea.vmem %s32_s22, 512  ;;  %p3826_p1 = scmp.lt.s32.totalorder %s32_s22, %s32_s22 }
   0x5   :  { %p3822_p0 = scmp.ne.s32.totalorder %s32_s22, %s3821_s23  ;;  %p3827_p2 = scmp.lt.s32.totalorder %s3821_s23, %s3821_s23 }
   0x7   :  { %p3828_p3 = por %p3827_p2, %p3826_p1 }
   0x9   :  { %p3829_p4 = pnand %p3828_p3, %p3822_p0 }
   0xb   :  { %3832 = shalt.err (!%p3829_p4)
}
   0xc   :  { %s3900_s24 = smov 64   ;;  %s3901_s25 = smov 4  }
   0xd   :  { %37 = dma.hbm_to_vmem [thread:$0]  %s4388_s1, 512, %s32_s22, [#allocation6], %s3900_s24, %s3900_s24, %s3901_s25  }
   0xe   :  { %s3902_s28 = smov [#allocation2]  }
   0xf   :  { %s19_s29 = sshll.u32 %s3902_s28, 4  ;;  %s20_s29 = int_to_ptr.vmem [resolvable:$true] %s19_s29 }
  0x10   :  { %s3841_s30 = scalar_lea.vmem %s20_s29, 256  ;;  %p3846_p6 = scmp.lt.s32.totalorder %s20_s29, %s20_s29 }
  0x11   :  { %p3842_p5 = scmp.ne.s32.totalorder %s20_s29, %s3841_s30  ;;  %p3847_p7 = scmp.lt.s32.totalorder %s3841_s30, %s3841_s30 }
  0x13   :  { %p3848_p8 = por %p3847_p7, %p3846_p6 }
  0x15   :  { %p3849_p9 = pnand %p3848_p8, %p3842_p5 }
  0x17   :  { %3852 = shalt.err (!%p3849_p9)
}
  0x18   :  { %s3903_s7 = smov 128   ;;  %s3904_s8 = smov 8  }
  0x19   :  { %25 = dma.hbm_to_vmem [thread:$0]  %s4387_s0, 256, %s20_s29, [#allocation3], %s3903_s7, %s3903_s7, %s3904_s8  }
  0x1a   :  { %s3905_s1 = smov [#allocation7]  }
  0x1b   :  { %s43_s11 = sshll.u32 %s3905_s1, 4  ;;  %s44_s11 = int_to_ptr.vmem [resolvable:$true] %s43_s11 }
  0x1c   :  { %s3861_s12 = scalar_lea.vmem %s44_s11, 512  ;;  %p3866_p11 = scmp.lt.s32.totalorder %s44_s11, %s44_s11 }
  0x1d   :  { %p3862_p10 = scmp.ne.s32.totalorder %s44_s11, %s3861_s12  ;;  %p3867_p12 = scmp.lt.s32.totalorder %s3861_s12, %s3861_s12 }
  0x1f   :  { %p3868_p13 = por %p3867_p12, %p3866_p11 }
  0x21   :  { %p3869_p0 = pnand %p3868_p13, %p3862_p10 }
  0x23   :  { %3872 = shalt.err (!%p3869_p0)
}
  0x24   :  { %49 = dma.hbm_to_vmem [thread:$0]  %s4389_s2, 512, %s44_s11, [#allocation6], %s3900_s24, %s3900_s24, %s3901_s25  }
  0x25   :  { %3893 = dma.done.wait [#allocation3], 256  }
  0x26   :  { %3894 = vsyncadd [#allocation3], 4294967040 }
  0x27   :  { %3895 = dma.done.wait [#allocation6], 1024  }
  0x28   :  { %3896 = vsyncadd [#allocation6], 4294966272  ;;  %v3906_v0 = vmov 0.0   ;;  %vm3907_vm0 = vmmov 0   ;;  %vm84_vm1 = vcmask 64512   ;;  %v3967_v1 = vld [vmem:[#allocation2] sm:$0xff] }
  0x29   :  { %3468 = vmatprep.subr.mxu0 %v3906_v0  ;;  %3473 = vmatprep.subr.mxu1 %v3906_v0  ;;  %v3969_v2 = vld [vmem:[#allocation2 + $0x8] sm:$0xff]  ;;  %v3976_v3 = vmul.f32 0.35355338, %v3967_v1  ;;  %s3908_s0 = smov 120   ;;  %s3909_s2 = smov 112   ;;  %vm1409_vm2 = vcmask 130048  }
  0x2a   :  { %3470 = vmatprep.mubr.msk.f32.mxu0 %vm3907_vm0, %v3906_v0  ;;  %3475 = vmatprep.mubr.msk.f32.mxu1 %vm3907_vm0, %v3906_v0  ;;  %v3979_v4 = vmul.f32 0.35355338, %v3969_v2  ;;  %s3910_s15 = smov 104   ;;  %s3911_s16 = smov 16   ;;  %vm1412_vm3 = vcmask 195584   ;;  %vm1432_vm4 = vcmask 261120  }
  0x2b   :  { %3469 = vmatpush3.xpose.msk.msra.mxu0 %vm84_vm1, %v3967_v1  ;;  %3474 = vmatpush3.xpose.msk.msra.mxu1 %vm84_vm1, %v3969_v2  ;;  %s3912_s17 = smov 24  }
  0x2c   :  { %3478 = vmatprep.subr.mxu0 %v3906_v0  ;;  %3483 = vmatprep.subr.mxu1 %v3906_v0 }
  0x2d   :  { %485 = vrot.lane.b32.xlu1 %v3969_v2, %s3908_s0 }
  0x2e   :  { %3471 = vmatmul.mubr.msk.f32.vlgmr.msra.gmra.mxu0 %vm84_vm1, %v3976_v3  ;;  %3476 = vmatmul.mubr.msk.f32.vlgmr.msra.gmra.mxu1 %vm84_vm1, %v3979_v4 }
  0x2f   :  { %3479 = vmatpush3.msra.mxu0 %v3967_v1  ;;  %3480 = vmatprep.mubr.msk.f32.mxu0 %vm3907_vm0, %v3906_v0 }
  0x30   :  { %3488 = vmatprep.subr.mxu0 %v3906_v0  ;;  %3484 = vmatpush3.msra.mxu1 %v3969_v2 }
  0x31   :  { %3485 = vmatprep.mubr.msk.f32.mxu1 %vm3907_vm0, %v3906_v0  ;;  %3493 = vmatprep.subr.mxu1 %v3906_v0 }
  0x32   :  { %405 = vrot.lane.b32.xlu1 %v3976_v3, %s3908_s0 }
  0x9f   :  { %v486_v21 = vpop.permute.xlu1 %485 }
  0xa4   :  { %v406_v22 = vpop.permute.xlu1 %405 }
  0xee   :  { %v157_v5 = vpop.f32.mrf.mxu0  ;;  %v233_v6 = vpop.f32.mrf.mxu1 }
  0xef   :  { %v237_v7 = vsel %vm84_vm1, %v157_v5, -inf  ;;  %v240_v10 = vsel %vm84_vm1, %v233_v6, -inf }
  0xf0   :  { %238 = vmax.xlane.f32.xlu0 %v237_v7  ;;  %v3472_v8 = vpop.f32.mrf.mxu0  ;;  %v3477_v9 = vpop.f32.mrf.mxu1 }
  0xf4   :  { %241 = vmax.xlane.f32.xlu0 %v240_v10 }
 0x10a   :  { %407 = vrot.lane.b32.xlu0 %v3967_v1, %s3908_s0 }
 0x179   :  { %v239_v11 = vpop.xlane.xlu0 %238 }
 0x17a   :  { %v243_v12 = vsub.f32 %v157_v5, %v239_v11 }
 0x17c   :  { %v245_v13 = vmul.f32 1.442695, %v243_v12 }
 0x17d   :  { %v242_v14 = vpop.xlane.xlu0 %241 }
 0x17e   :  { %3733 = vpow2.f32 %v245_v13  ;;  %v244_v15 = vsub.f32 %v233_v6, %v242_v14 }
 0x180   :  { %v247_v16 = vmul.f32 1.442695, %v244_v15 }
 0x181   :  { %v408_v26 = vpop.permute.xlu0 %407 }
 0x182   :  { %3735 = vpow2.f32 %v247_v16 }
 0x18b   :  { %v3734_v17 = vpop.eup %3733 }
 0x18c   :  { %v249_v18 = vsel %vm84_vm1, %v3734_v17, 0.0 }
 0x18d   :  { %250 = vadd.xlane.f32.xlu1 %v249_v18 }
 0x18f   :  { %v3736_v19 = vpop.eup %3735 }
 0x190   :  { %v252_v20 = vsel %vm84_vm1, %v3736_v19, 0.0 }
 0x191   :  { %253 = vadd.xlane.f32.xlu1 %v252_v20 }
 0x1a2   :  { %483 = vrot.lane.b32.xlu1 %v3979_v4, %s3908_s0 }
 0x216   :  { %v251_v23 = vpop.xlane.xlu1 %250 }
 0x217   :  { %3737 = vrcp.f32 %v251_v23 }
 0x21a   :  { %v254_v24 = vpop.xlane.xlu1 %253 }
 0x21b   :  { %3739 = vrcp.f32 %v254_v24 }
 0x21e   :  { %v484_v30 = vpop.permute.xlu1 %483 }
 0x224   :  { %v3738_v25 = vpop.eup %3737 }
 0x225   :  { %v257_v27 = vmul.f32 %v3738_v25, %v3734_v17 }
 0x227   :  { %3481 = vmatmul.mubr.msk.f32.vlgmr.msra.gmra.mxu0 %vm84_vm1, %v257_v27 }
 0x228   :  { %v3740_v28 = vpop.eup %3739  ;;  %3489 = vmatpush3.xpose.msk.msra.mxu0 %vm84_vm1, %v408_v26  ;;  %3490 = vmatprep.mubr.msk.f32.mxu0 %vm3907_vm0, %v3906_v0 }
 0x229   :  { %3498 = vmatprep.subr.mxu0 %v3906_v0  ;;  %v258_v29 = vmul.f32 %v3740_v28, %v3736_v19 }
 0x22b   :  { %3486 = vmatmul.mubr.msk.f32.vlgmr.msra.gmra.mxu1 %vm84_vm1, %v258_v29  ;;  %3491 = vmatmul.mubr.msk.f32.vlgmr.msra.gmra.mxu0 %vm84_vm1, %v406_v22 }
 0x22c   :  { %3494 = vmatpush3.xpose.msk.msra.mxu1 %vm84_vm1, %v486_v21  ;;  %3499 = vmatpush3.msra.mxu0 %v408_v26 }
 0x22d   :  { %3495 = vmatprep.mubr.msk.f32.mxu1 %vm3907_vm0, %v3906_v0  ;;  %3503 = vmatprep.subr.mxu1 %v3906_v0 }
 0x22e   :  { %3500 = vmatprep.mubr.msk.f32.mxu0 %vm3907_vm0, %v3906_v0  ;;  %3508 = vmatprep.subr.mxu0 %v3906_v0 }
 0x22f   :  { %3496 = vmatmul.mubr.msk.f32.vlgmr.msra.gmra.mxu1 %vm84_vm1, %v484_v30 }
 0x230   :  { %3504 = vmatpush3.msra.mxu1 %v486_v21  ;;  %3505 = vmatprep.mubr.msk.f32.mxu1 %vm3907_vm0, %v3906_v0 }
 0x231   :  { %3513 = vmatprep.subr.mxu1 %v3906_v0 }
 0x2e7   :  { %v4025_v31 = vpop.f32.mrf.mxu0 }
 0x2e9   :  { %v3482_v32 = vpop.f32.mrf.mxu0 }
 0x2eb   :  { %v4027_v33 = vpop.f32.mrf.mxu1  ;;  %v479_v34 = vpop.f32.mrf.mxu0 }
 0x2ec   :  { %v561_v35 = vsel %vm84_vm1, %v479_v34, -inf }
 0x2ed   :  { %v3487_v36 = vpop.f32.mrf.mxu1  ;;  %562 = vmax.xlane.f32.xlu0 %v561_v35  ;;  %v3492_v37 = vpop.f32.mrf.mxu0 }
 0x2ef   :  { %v557_v38 = vpop.f32.mrf.mxu1 }
 0x2f0   :  { %v564_v39 = vsel %vm84_vm1, %v557_v38, -inf }
 0x2f1   :  { %565 = vmax.xlane.f32.xlu1 %v564_v39  ;;  %v3497_v40 = vpop.f32.mrf.mxu1 }
 0x302   :  { %811 = vrot.lane.b32.xlu1 %v3969_v2, %s3909_s2 }
 0x306   :  { %731 = vrot.lane.b32.xlu1 %v3976_v3, %s3909_s2 }
 0x30a   :  { %809 = vrot.lane.b32.xlu1 %v3979_v4, %s3909_s2 }
 0x376   :  { %v563_v41 = vpop.xlane.xlu0 %562 }
 0x377   :  { %v567_v42 = vsub.f32 %v479_v34, %v563_v41 }
 0x379   :  { %v569_v43 = vmul.f32 1.442695, %v567_v42 }
 0x37a   :  { %v566_v44 = vpop.xlane.xlu1 %565 }
 0x37b   :  { %3741 = vpow2.f32 %v569_v43  ;;  %v568_v45 = vsub.f32 %v557_v38, %v566_v44 }
 0x37d   :  { %v571_v46 = vmul.f32 1.442695, %v568_v45 }
 0x37e   :  { %v812_v53 = vpop.permute.xlu1 %811 }
 0x37f   :  { %3743 = vpow2.f32 %v571_v46 }
 0x382   :  { %v732_v57 = vpop.permute.xlu1 %731 }
 0x386   :  { %v810_v60 = vpop.permute.xlu1 %809 }
 0x388   :  { %v3742_v47 = vpop.eup %3741 }
 0x389   :  { %v573_v48 = vsel %vm84_vm1, %v3742_v47, 0.0 }
 0x38a   :  { %574 = vadd.xlane.f32.xlu0 %v573_v48 }
 0x38c   :  { %v3744_v49 = vpop.eup %3743 }
 0x38d   :  { %v576_v50 = vsel %vm84_vm1, %v3744_v49, 0.0 }
 0x38e   :  { %577 = vadd.xlane.f32.xlu0 %v576_v50 }
 0x3a4   :  { %733 = vrot.lane.b32.xlu0 %v3967_v1, %s3909_s2 }
 0x413   :  { %v575_v51 = vpop.xlane.xlu0 %574 }
 0x414   :  { %3745 = vrcp.f32 %v575_v51 }
 0x417   :  { %v578_v52 = vpop.xlane.xlu0 %577 }
 0x418   :  { %3747 = vrcp.f32 %v578_v52 }
 0x41b   :  { %v734_v55 = vpop.permute.xlu0 %733 }
 0x421   :  { %v3746_v54 = vpop.eup %3745 }
 0x422   :  { %v581_v56 = vmul.f32 %v3746_v54, %v3742_v47 }
 0x424   :  { %3501 = vmatmul.mubr.msk.f32.vlgmr.msra.gmra.mxu0 %vm84_vm1, %v581_v56 }
 0x425   :  { %v3748_v58 = vpop.eup %3747  ;;  %3509 = vmatpush3.xpose.msk.msra.mxu0 %vm84_vm1, %v734_v55  ;;  %3510 = vmatprep.mubr.msk.f32.mxu0 %vm3907_vm0, %v3906_v0 }
 0x426   :  { %3518 = vmatprep.subr.mxu0 %v3906_v0  ;;  %v582_v59 = vmul.f32 %v3748_v58, %v3744_v49 }
 0x428   :  { %3506 = vmatmul.mubr.msk.f32.vlgmr.msra.gmra.mxu1 %vm84_vm1, %v582_v59  ;;  %3511 = vmatmul.mubr.msk.f32.vlgmr.msra.gmra.mxu0 %vm84_vm1, %v732_v57 }
 0x429   :  { %3514 = vmatpush3.xpose.msk.msra.mxu1 %vm84_vm1, %v812_v53  ;;  %3519 = vmatpush3.msra.mxu0 %v734_v55 }
 0x42a   :  { %3515 = vmatprep.mubr.msk.f32.mxu1 %vm3907_vm0, %v3906_v0  ;;  %3523 = vmatprep.subr.mxu1 %v3906_v0 }
 0x42b   :  { %3520 = vmatprep.mubr.msk.f32.mxu0 %vm3907_vm0, %v3906_v0  ;;  %3528 = vmatprep.subr.mxu0 %v3906_v0 }
 0x42c   :  { %3516 = vmatmul.mubr.msk.f32.vlgmr.msra.gmra.mxu1 %vm84_vm1, %v810_v60  ;;  %v3721_v60 = vld [vmem:[#allocation5 + $0x8] sm:$0xff]  }
 0x42d   :  { %3524 = vmatpush3.msra.mxu1 %v812_v53  ;;  %3525 = vmatprep.mubr.msk.f32.mxu1 %vm3907_vm0, %v3906_v0 }
 0x42e   :  { %3533 = vmatprep.subr.mxu1 %v3906_v0 }
 0x4e4   :  { %v4059_v61 = vpop.f32.mrf.mxu0 }
 0x4e6   :  { %v3502_v62 = vpop.f32.mrf.mxu0 }
 0x4e8   :  { %v4061_v63 = vpop.f32.mrf.mxu1  ;;  %v805_v5 = vpop.f32.mrf.mxu0 }
 0x4e9   :  { %v3691_v6 = vpack.i.bf16 %v4061_v63, %v4059_v61  ;;  %v887_v7 = vsel %vm84_vm1, %v805_v5, -inf  ;;  %v3722_v61 = vld [vmem:[#allocation5] sm:$0xff]  }
 0x4ea   :  { %v3507_v8 = vpop.f32.mrf.mxu1  ;;  %888 = vmax.xlane.f32.xlu0 %v887_v7  ;;  %v3512_v9 = vpop.f32.mrf.mxu0 }
 0x4ec   :  { %v883_v10 = vpop.f32.mrf.mxu1 }
 0x4ed   :  { %v890_v11 = vsel %vm84_vm1, %v883_v10, -inf }
 0x4ee   :  { %891 = vmax.xlane.f32.xlu1 %v890_v11  ;;  %v3517_v12 = vpop.f32.mrf.mxu1 }
 0x4ff   :  { %1137 = vrot.lane.b32.xlu1 %v3969_v2, %s3910_s15 }
 0x503   :  { %1057 = vrot.lane.b32.xlu1 %v3976_v3, %s3910_s15 }
 0x507   :  { %1135 = vrot.lane.b32.xlu1 %v3979_v4, %s3910_s15 }
 0x573   :  { %v889_v13 = vpop.xlane.xlu0 %888 }
 0x574   :  { %v893_v14 = vsub.f32 %v805_v5, %v889_v13 }
 0x576   :  { %v895_v15 = vmul.f32 1.442695, %v893_v14 }
 0x577   :  { %v892_v16 = vpop.xlane.xlu1 %891 }
 0x578   :  { %3749 = vpow2.f32 %v895_v15  ;;  %v894_v17 = vsub.f32 %v883_v10, %v892_v16 }
 0x57a   :  { %v897_v18 = vmul.f32 1.442695, %v894_v17 }
 0x57b   :  { %v1138_v23 = vpop.permute.xlu1 %1137 }
 0x57c   :  { %3751 = vpow2.f32 %v897_v18 }
 0x57f   :  { %v1058_v27 = vpop.permute.xlu1 %1057 }
 0x583   :  { %v1136_v30 = vpop.permute.xlu1 %1135 }
 0x585   :  { %v3750_v19 = vpop.eup %3749 }
 0x586   :  { %v899_v20 = vsel %vm84_vm1, %v3750_v19, 0.0 }
 0x587   :  { %900 = vadd.xlane.f32.xlu0 %v899_v20 }
 0x589   :  { %v3752_v21 = vpop.eup %3751 }
 0x58a   :  { %v902_v22 = vsel %vm84_vm1, %v3752_v21, 0.0 }
 0x58b   :  { %903 = vadd.xlane.f32.xlu0 %v902_v22 }
 0x5a1   :  { %1059 = vrot.lane.b32.xlu0 %v3967_v1, %s3910_s15 }
 0x610   :  { %v901_v3 = vpop.xlane.xlu0 %900 }
 0x611   :  { %3753 = vrcp.f32 %v901_v3 }
 0x614   :  { %v904_v4 = vpop.xlane.xlu0 %903 }
 0x615   :  { %3755 = vrcp.f32 %v904_v4 }
 0x618   :  { %v1060_v25 = vpop.permute.xlu0 %1059 }
 0x61e   :  { %v3754_v24 = vpop.eup %3753 }
 0x61f   :  { %v907_v26 = vmul.f32 %v3754_v24, %v3750_v19 }
 0x621   :  { %3521 = vmatmul.mubr.msk.f32.vlgmr.msra.gmra.mxu0 %vm84_vm1, %v907_v26 }
 0x622   :  { %v3756_v28 = vpop.eup %3755  ;;  %3529 = vmatpush3.xpose.msk.msra.mxu0 %vm84_vm1, %v1060_v25  ;;  %3530 = vmatprep.mubr.msk.f32.mxu0 %vm3907_vm0, %v3906_v0 }
 0x623   :  { %3538 = vmatprep.subr.mxu0 %v3906_v0  ;;  %v908_v29 = vmul.f32 %v3756_v28, %v3752_v21 }
 0x625   :  { %3526 = vmatmul.mubr.msk.f32.vlgmr.msra.gmra.mxu1 %vm84_vm1, %v908_v29  ;;  %3531 = vmatmul.mubr.msk.f32.vlgmr.msra.gmra.mxu0 %vm84_vm1, %v1058_v27 }
 0x626   :  { %3534 = vmatpush3.xpose.msk.msra.mxu1 %vm84_vm1, %v1138_v23  ;;  %3539 = vmatpush3.msra.mxu0 %v1060_v25 }
 0x627   :  { %3535 = vmatprep.mubr.msk.f32.mxu1 %vm3907_vm0, %v3906_v0  ;;  %3543 = vmatprep.subr.mxu1 %v3906_v0 }
 0x628   :  { %3540 = vmatprep.mubr.msk.f32.mxu0 %vm3907_vm0, %v3906_v0  ;;  %3564 = vmatprep.subr.bf16.mxu0 %v3906_v0 }
 0x629   :  { %3536 = vmatmul.mubr.msk.f32.vlgmr.msra.gmra.mxu1 %vm84_vm1, %v1136_v30 }
 0x62a   :  { %3544 = vmatpush3.msra.mxu1 %v1138_v23  ;;  %3545 = vmatprep.mubr.msk.f32.mxu1 %vm3907_vm0, %v3906_v0  ;;  %v4130_v23 = vld [vmem:[%s4391_s4] sm:$0x3f] }
 0x62b   :  { %3548 = vmatprep.subr.bf16.mxu1 %v3906_v0 }
 0x6e1   :  { %v979_v32 = vpop.f32.mrf.mxu0 }
 0x6e3   :  { %v3522_v34 = vpop.f32.mrf.mxu0 }
 0x6e5   :  { %v1053_v35 = vpop.f32.mrf.mxu1  ;;  %v1131_v36 = vpop.f32.mrf.mxu0 }
 0x6e6   :  { %v1213_v37 = vsel %vm84_vm1, %v1131_v36, -inf  ;;  %v3696_v43 = vpack.i.bf16 %v1053_v35, %v979_v32 }
 0x6e7   :  { %v3527_v38 = vpop.f32.mrf.mxu1  ;;  %1214 = vmax.xlane.f32.xlu0 %v1213_v37  ;;  %v3532_v39 = vpop.f32.mrf.mxu0 }
 0x6e9   :  { %v1209_v40 = vpop.f32.mrf.mxu1 }
 0x6ea   :  { %v1216_v41 = vsel %vm84_vm1, %v1209_v40, -inf }
 0x6eb   :  { %1217 = vmax.xlane.f32.xlu1 %v1216_v41  ;;  %v3537_v42 = vpop.f32.mrf.mxu1 }
 0x6fc   :  { %3697 = vrot.lane.b32.xlu1 %v3696_v43, %s3911_s16 }
 0x770   :  { %v1215_v44 = vpop.xlane.xlu0 %1214 }
 0x771   :  { %v1219_v45 = vsub.f32 %v1131_v36, %v1215_v44 }
 0x773   :  { %v1221_v46 = vmul.f32 1.442695, %v1219_v45 }
 0x774   :  { %v1218_v47 = vpop.xlane.xlu1 %1217 }
 0x775   :  { %3757 = vpow2.f32 %v1221_v46  ;;  %v1220_v48 = vsub.f32 %v1209_v40, %v1218_v47  ;;  %v3723_v46 = vld [vmem:[#allocation7 + $0x8] sm:$0xff]   ;;  %v3725_v47 = vld [vmem:[%s4390_s3 + $0x8] sm:$0xff]  }
 0x777   :  { %v1223_v49 = vmul.f32 1.442695, %v1220_v48 }
 0x778   :  { %v3698_v11 = vpop.permute.xlu1 %3697 }
 0x779   :  { %3759 = vpow2.f32 %v1223_v49  ;;  %v3700_v14 = vunpack.i.h.bf16 %v3698_v11  ;;  %v3699_v15 = vunpack.i.l.bf16 %v3698_v11 }
 0x782   :  { %v3758_v50 = vpop.eup %3757 }
 0x783   :  { %v1225_v51 = vsel %vm84_vm1, %v3758_v50, 0.0 }
 0x784   :  { %1226 = vadd.xlane.f32.xlu0 %v1225_v51 }
 0x786   :  { %v3760_v52 = vpop.eup %3759 }
 0x787   :  { %v1228_v53 = vsel %vm84_vm1, %v3760_v52, 0.0 }
 0x788   :  { %1229 = vadd.xlane.f32.xlu0 %v1228_v53 }
 0x79e   :  { %3692 = vrot.lane.b32.xlu0 %v3691_v6, %s3904_s8 }
 0x80d   :  { %v1227_v54 = vpop.xlane.xlu0 %1226 }
 0x80e   :  { %3761 = vrcp.f32 %v1227_v54 }
 0x811   :  { %v1230_v55 = vpop.xlane.xlu0 %1229 }
 0x812   :  { %3763 = vrcp.f32 %v1230_v55 }
 0x815   :  { %v3693_v8 = vpop.permute.xlu0 %3692 }
 0x816   :  { %v3695_v9 = vunpack.i.h.bf16 %v3693_v8  ;;  %v3694_v10 = vunpack.i.l.bf16 %v3693_v8  ;;  %v3726_v8 = vld [vmem:[%s4390_s3] sm:$0xff]  }
 0x818   :  { %v1408_v12 = vsel %vm84_vm1, %v4027_v33, %v3695_v9  ;;  %v1407_v13 = vsel %vm84_vm1, %v4025_v31, %v3694_v10  ;;  %v1416_v31 = vlaneseq  ;;  %v3341_v9 = vld [vmem:[%s4392_s5] ss:$0 sm:$0xff] }
 0x819   :  { %v1410_v19 = vsel %vm1409_vm2, %v1407_v13, %v3699_v15  ;;  %v1411_v20 = vsel %vm1409_vm2, %v1408_v12, %v3700_v14 }
 0x81a   :  { %v4124_v3 = vshrl.u32 %v1416_v31, 7 }
 0x81b   :  { %v3762_v56 = vpop.eup %3761 }
 0x81c   :  { %v1233_v57 = vmul.f32 %v3762_v56, %v3758_v50  ;;  %v1418_v4 = vsub.s32 0, %v4124_v3  ;;  %v1508_v54 = vsub.s32 1, %v4124_v3 }
 0x81e   :  { %3541 = vmatmul.mubr.msk.f32.vlgmr.msra.gmra.mxu0 %vm84_vm1, %v1233_v57  ;;  %v1419_v24 = vrot.slane %v4130_v23, %v1418_v4  ;;  %v1509_v57 = vrot.slane %v4130_v23, %v1508_v54 }
 0x81f   :  { %v3764_v58 = vpop.eup %3763  ;;  %3568 = vmatprep.mubr.msk.bf16.mxu0 %vm3907_vm0, %v3906_v0  ;;  %3565 = vmatpush3.bf16.xpose.msra.mxu0 %v3725_v47  ;;  %v1677_v47 = vsub.s32 4, %v4124_v3 }
 0x820   :  { %v1234_v59 = vmul.f32 %v3764_v58, %v3760_v52  ;;  %3566 = vmatprep.subr.bf16.mxu0 %v3906_v0  ;;  %v1514_v58 = vsub.s32 2, %v4124_v3 }
 0x822   :  { %3546 = vmatmul.mubr.msk.f32.vlgmr.msra.gmra.mxu1 %vm84_vm1, %v1234_v59 }
 0x823   :  { %3552 = vmatprep.mubr.msk.bf16.mxu1 %vm3907_vm0, %v3906_v0  ;;  %3549 = vmatpush3.bf16.msra.mxu1 %v3721_v60 }
 0x824   :  { %3550 = vmatprep.subr.bf16.mxu1 %v3906_v0 }
 0x827   :  { %3551 = vmatpush3.bf16.msra.mxu1 %v3722_v61  ;;  %3567 = vmatpush3.bf16.xpose.msra.mxu0 %v3726_v8 }
 0x828   :  { %3556 = vmatprep.subr.bf16.mxu1 %v3906_v0  ;;  %3592 = vmatprep.subr.mxu0 %v3906_v0 }
 0x8de   :  { %v1305_v62 = vpop.f32.mrf.mxu0 }
 0x8e0   :  { %v3542_v63 = vpop.f32.mrf.mxu0 }
 0x8e2   :  { %v1379_v5 = vpop.f32.mrf.mxu1 }
 0x8e3   :  { %v3701_v6 = vpack.i.bf16 %v1379_v5, %v1305_v62  ;;  %v1515_v62 = vrot.slane %v4130_v23, %v1514_v58 }
 0x8e4   :  { %v3547_v7 = vpop.f32.mrf.mxu1 }
 0x8e5   :  { %3702 = vrot.lane.b32.xlu1 %v3701_v6, %s3912_s17 }
 0x957   :  { %v3703_v16 = vpop.permute.xlu1 %3702 }
 0x958   :  { %v3705_v17 = vunpack.i.h.bf16 %v3703_v16  ;;  %v3704_v18 = vunpack.i.l.bf16 %v3703_v16 }
 0x95a   :  { %v1414_v21 = vsel %vm1412_vm3, %v1411_v20, %v3705_v17  ;;  %v1413_v22 = vsel %vm1412_vm3, %v1410_v19, %v3704_v18  ;;  %v1586_v19 = vsub.s32 5, %v4124_v3 }
 0x95b   :  { %v1415_v33 = vpack.c.bf16 %v1414_v21, %v1413_v22 }
 0x95c   :  { %v1587_v20 = vrot.slane %v4130_v23, %v1586_v19 }
 0x95d   :  { %3553 = vmatmul.mubr.msk.bf16.vlgmr.msra.gmra.mxu1 %vm1432_vm4, %v1415_v33 }
 0x95e   :  { %3560 = vmatprep.mubr.msk.bf16.mxu1 %vm3907_vm0, %v3906_v0  ;;  %3557 = vmatpush3.bf16.msra.mxu1 %v3723_v46 }
 0x95f   :  { %3558 = vmatprep.subr.bf16.mxu1 %v3906_v0 }
 0xa1d   :  { %v1470_v25 = vpop.f32.mrf.mxu1 }
 0xa1e   :  { %v1471_v26 = vadd.f32 %v1470_v25, %v1419_v24 }
 0xa1f   :  { %v3554_v27 = vpop.f32.mrf.mxu1 }
 0xa20   :  { %v1477_v28 = vadd.f32 %v1471_v26, %v3967_v1 }
 0xa21   :  { %v1473_v29 = vpop.f32.mrf.mxu1 }
 0xa22   :  { %v1474_v30 = vadd.f32 %v1473_v29, %v1419_v24  ;;  %v1479_v32 = vsel %vm1432_vm4, %v1477_v28, 0.0 }
 0xa23   :  { %1480 = vadd.xlane.f32.xlu1 %v1479_v32  ;;  %v3555_v34 = vpop.f32.mrf.mxu1 }
 0xa24   :  { %v1478_v35 = vadd.f32 %v1474_v30, %v3969_v2  ;;  %v3724_v2 = vld [vmem:[#allocation7] sm:$0xff]  }
 0xa25   :  { %3559 = vmatpush3.bf16.msra.mxu1 %v3724_v2  ;;  %v1671_v2 = vsub.s32 3, %v4124_v3 }
 0xa26   :  { %v1482_v36 = vsel %vm1432_vm4, %v1478_v35, 0.0  ;;  %3572 = vmatprep.subr.mxu1 %v3906_v0 }
 0xa27   :  { %1483 = vadd.xlane.f32.xlu0 %v1482_v36 }
 0xaac   :  { %v1481_v37 = vpop.xlane.xlu1 %1480 }
 0xaad   :  { %v1486_v38 = vmul.f32 0.03125, %v1481_v37 }
 0xaaf   :  { %v1488_v39 = vsub.f32 %v1477_v28, %v1486_v38 }
 0xab0   :  { %v1484_v40 = vpop.xlane.xlu0 %1483 }
 0xab1   :  { %v1487_v41 = vmul.f32 0.03125, %v1484_v40  ;;  %v1490_v42 = vmul.f32 %v1488_v39, %v1488_v39 }
 0xab3   :  { %v1489_v43 = vsub.f32 %v1478_v35, %v1487_v41  ;;  %v1492_v1 = vsel %vm1432_vm4, %v1490_v42, 0.0 }
 0xab4   :  { %1493 = vadd.xlane.f32.xlu0 %v1492_v1 }
 0xab5   :  { %v1491_v44 = vmul.f32 %v1489_v43, %v1489_v43 }
 0xab7   :  { %v1495_v45 = vsel %vm1432_vm4, %v1491_v44, 0.0 }
 0xab8   :  { %1496 = vadd.xlane.f32.xlu0 %v1495_v45 }
 0xb3d   :  { %v1494_v48 = vpop.xlane.xlu0 %1493 }
 0xb3e   :  { %v1498_v49 = vmul.f32 0.03125, %v1494_v48  ;;  %v1672_v48 = vrot.slane %v4130_v23, %v1671_v2 }
 0xb40   :  { %v1500_v50 = vadd.f32 1e-06, %v1498_v49 }
 0xb41   :  { %v1497_v51 = vpop.xlane.xlu0 %1496 }
 0xb42   :  { %3765 = vrsqrt.f32 %v1500_v50  ;;  %v1499_v52 = vmul.f32 0.03125, %v1497_v51  ;;  %v1678_v50 = vrot.slane %v4130_v23, %v1677_v47 }
 0xb44   :  { %v1501_v53 = vadd.f32 1e-06, %v1499_v52 }
 0xb46   :  { %3767 = vrsqrt.f32 %v1501_v53 }
 0xb4f   :  { %v3766_v55 = vpop.eup %3765 }
 0xb50   :  { %v1504_v56 = vmul.f32 %v3766_v55, %v1488_v39 }
 0xb52   :  { %v1510_v61 = vmul.f32 %v1509_v57, %v1504_v56 }
 0xb53   :  { %v3768_v59 = vpop.eup %3767 }
 0xb54   :  { %v1505_v60 = vmul.f32 %v3768_v59, %v1489_v43  ;;  %v1516_v5 = vadd.f32 %v1515_v62, %v1510_v61 }
 0xb56   :  { %v1511_v63 = vmul.f32 %v1509_v57, %v1505_v60 }
 0xb58   :  { %v1517_v6 = vadd.f32 %v1515_v62, %v1511_v63 }
 0xb5a   :  { %v1518_v7 = vpack.c.bf16 %v1517_v6, %v1516_v5 }
 0xb5c   :  { %3561 = vmatmul.mubr.msk.bf16.vlgmr.msra.gmra.mxu1 %vm1432_vm4, %v1518_v7 }
 0xb5d   :  { %3574 = vmatprep.mubr.msk.f32.mxu1 %vm3907_vm0, %v3906_v0 }
 0xc1c   :  { %v1574_v10 = vpop.f32.mrf.mxu1 }
 0xc1d   :  { %v1575_v12 = vadd.f32 %v3341_v9, %v1574_v10 }
 0xc1e   :  { %v3562_v11 = vpop.f32.mrf.mxu1 }
 0xc1f   :  { %v1581_v16 = vmax.f32 %v1575_v12, 0.0 }
 0xc20   :  { %v1577_v13 = vpop.f32.mrf.mxu1 }
 0xc21   :  { %v1578_v14 = vadd.f32 %v3341_v9, %v1577_v13 }
 0xc22   :  { %v3563_v15 = vpop.f32.mrf.mxu1 }
 0xc23   :  { %v1582_v17 = vmax.f32 %v1578_v14, 0.0 }
 0xc25   :  { %v1583_v18 = vpack.c.bf16 %v1582_v17, %v1581_v16 }
 0xc27   :  { %3569 = vmatmul.mubr.bf16.vlgmr.msra.gmra.mxu0 %v1583_v18 }
 0xc28   :  { %3594 = vmatprep.mubr.msk.f32.mxu0 %vm3907_vm0, %v3906_v0 }
 0xce7   :  { %v1634_v21 = vpop.f32.mrf.mxu0 }
 0xce8   :  { %v1635_v22 = vadd.f32 %v1634_v21, %v1587_v20 }
 0xce9   :  { %v3570_v33 = vpop.f32.mrf.mxu0 }
 0xcea   :  { %v1641_v31 = vadd.f32 %v1635_v22, %v1516_v5 }
 0xceb   :  { %v1637_v24 = vpop.f32.mrf.mxu0 }
 0xcec   :  { %v1638_v25 = vadd.f32 %v1637_v24, %v1587_v20  ;;  %v1643_v26 = vsel %vm1432_vm4, %v1641_v31, 0.0 }
 0xced   :  { %1644 = vadd.xlane.f32.xlu1 %v1643_v26  ;;  %v3571_v27 = vpop.f32.mrf.mxu0 }
 0xcee   :  { %v1642_v28 = vadd.f32 %v1638_v25, %v1517_v6 }
 0xcf0   :  { %v1646_v29 = vsel %vm1432_vm4, %v1642_v28, 0.0 }
 0xcf1   :  { %1647 = vadd.xlane.f32.xlu0 %v1646_v29 }
 0xd76   :  { %v1645_v30 = vpop.xlane.xlu1 %1644 }
 0xd77   :  { %v1649_v32 = vmul.f32 0.03125, %v1645_v30 }
 0xd79   :  { %v1651_v34 = vsub.f32 %v1641_v31, %v1649_v32 }
 0xd7a   :  { %v1648_v35 = vpop.xlane.xlu0 %1647 }
 0xd7b   :  { %v1650_v36 = vmul.f32 0.03125, %v1648_v35  ;;  %v1653_v37 = vmul.f32 %v1651_v34, %v1651_v34 }
 0xd7d   :  { %v1652_v38 = vsub.f32 %v1642_v28, %v1650_v36  ;;  %v1655_v39 = vsel %vm1432_vm4, %v1653_v37, 0.0 }
 0xd7e   :  { %1656 = vadd.xlane.f32.xlu1 %v1655_v39 }
 0xd7f   :  { %v1654_v40 = vmul.f32 %v1652_v38, %v1652_v38 }
 0xd81   :  { %v1658_v41 = vsel %vm1432_vm4, %v1654_v40, 0.0 }
 0xd82   :  { %1659 = vadd.xlane.f32.xlu0 %v1658_v41 }
 0xe07   :  { %v1657_v42 = vpop.xlane.xlu1 %1656 }
 0xe08   :  { %v1661_v43 = vmul.f32 0.03125, %v1657_v42 }
 0xe0a   :  { %v1663_v1 = vadd.f32 1e-06, %v1661_v43 }
 0xe0b   :  { %v1660_v44 = vpop.xlane.xlu0 %1659 }
 0xe0c   :  { %3769 = vrsqrt.f32 %v1663_v1  ;;  %v1662_v45 = vmul.f32 0.03125, %v1660_v44 }
 0xe0e   :  { %v1664_v46 = vadd.f32 1e-06, %v1662_v45 }
 0xe10   :  { %3771 = vrsqrt.f32 %v1664_v46 }
 0xe19   :  { %v3770_v49 = vpop.eup %3769 }
 0xe1a   :  { %v1667_v51 = vmul.f32 %v3770_v49, %v1651_v34 }
 0xe1c   :  { %v1673_v52 = vmul.f32 %v1672_v48, %v1667_v51 }
 0xe1d   :  { %v3772_v53 = vpop.eup %3771 }
 0xe1e   :  { %v4183_v55 = vadd.f32 %v1678_v50, %v1673_v52  ;;  %v1668_v56 = vmul.f32 %v3772_v53, %v1652_v38 }
 0xe20   :  { %v1674_v57 = vmul.f32 %v1672_v48, %v1668_v56  ;;  %3573 = vmatpush3.xpose.msk.msra.mxu1 %vm84_vm1, %v4183_v55  ;;  %v4188_v59 = vmul.f32 0.35355338, %v4183_v55 }
 0xe21   :  { %3577 = vmatprep.subr.mxu1 %v3906_v0 }
 0xe22   :  { %v4191_v60 = vadd.f32 %v1678_v50, %v1674_v57 }
 0xe23   :  { %3575 = vmatmul.mubr.msk.f32.vlgmr.msra.gmra.mxu1 %vm84_vm1, %v4188_v59 }
 0xe24   :  { %3578 = vmatpush3.xpose.msk.msra.mxu1 %vm84_vm1, %v4191_v60  ;;  %3579 = vmatprep.mubr.msk.f32.mxu1 %vm3907_vm0, %v3906_v0  ;;  %v4200_v23 = vmul.f32 0.35355338, %v4191_v60 }
 0xe25   :  { %3582 = vmatprep.subr.mxu1 %v3906_v0 }
 0xe27   :  { %3580 = vmatmul.mubr.msk.f32.vlgmr.msra.gmra.mxu1 %vm84_vm1, %v4200_v23 }
 0xe28   :  { %3583 = vmatpush3.msra.mxu1 %v4183_v55  ;;  %3584 = vmatprep.mubr.msk.f32.mxu1 %vm3907_vm0, %v3906_v0 }
 0xe29   :  { %3587 = vmatprep.subr.mxu1 %v3906_v0 }
 0xee3   :  { %v1774_v61 = vpop.f32.mrf.mxu1 }
 0xee4   :  { %v1854_v62 = vsel %vm84_vm1, %v1774_v61, -inf }
 0xee5   :  { %1855 = vmax.xlane.f32.xlu1 %v1854_v62  ;;  %v3576_v63 = vpop.f32.mrf.mxu1 }
 0xee7   :  { %v1850_v5 = vpop.f32.mrf.mxu1 }
 0xee8   :  { %v1857_v6 = vsel %vm84_vm1, %v1850_v5, -inf }
 0xee9   :  { %1858 = vmax.xlane.f32.xlu0 %v1857_v6  ;;  %v3581_v7 = vpop.f32.mrf.mxu1 }
 0xef6   :  { %2024 = vrot.lane.b32.xlu1 %v4183_v55, %s3908_s0 }
 0xf6e   :  { %v1856_v8 = vpop.xlane.xlu1 %1855 }
 0xf6f   :  { %v1860_v9 = vsub.f32 %v1774_v61, %v1856_v8 }
 0xf71   :  { %v1862_v10 = vmul.f32 1.442695, %v1860_v9 }
 0xf72   :  { %v2025_v11 = vpop.permute.xlu1 %2024  ;;  %v1859_v12 = vpop.xlane.xlu0 %1858 }
 0xf73   :  { %3773 = vpow2.f32 %v1862_v10  ;;  %v1861_v13 = vsub.f32 %v1850_v5, %v1859_v12  ;;  %3593 = vmatpush3.xpose.msk.msra.mxu0 %vm84_vm1, %v2025_v11 }
 0xf74   :  { %3602 = vmatprep.subr.mxu0 %v3906_v0 }
 0xf75   :  { %v1864_v14 = vmul.f32 1.442695, %v1861_v13 }
 0xf77   :  { %3775 = vpow2.f32 %v1864_v14 }
 0xf80   :  { %v3774_v15 = vpop.eup %3773 }
 0xf81   :  { %v1866_v16 = vsel %vm84_vm1, %v3774_v15, 0.0 }
 0xf82   :  { %1867 = vadd.xlane.f32.xlu1 %v1866_v16 }
 0xf84   :  { %v3776_v17 = vpop.eup %3775 }
 0xf85   :  { %v1869_v18 = vsel %vm84_vm1, %v3776_v17, 0.0 }
 0xf86   :  { %1870 = vadd.xlane.f32.xlu0 %v1869_v18 }
 0xf93   :  { %2022 = vrot.lane.b32.xlu1 %v4188_v59, %s3908_s0 }
 0xf97   :  { %2100 = vrot.lane.b32.xlu1 %v4200_v23, %s3908_s0 }
 0xf9c   :  { %2102 = vrot.lane.b32.xlu0 %v4191_v60, %s3908_s0 }
0x100b   :  { %v1868_v20 = vpop.xlane.xlu1 %1867 }
0x100c   :  { %3777 = vrcp.f32 %v1868_v20 }
0x100f   :  { %v2023_v21 = vpop.permute.xlu1 %2022  ;;  %v1871_v22 = vpop.xlane.xlu0 %1870 }
0x1010   :  { %3779 = vrcp.f32 %v1871_v22  ;;  %3595 = vmatmul.mubr.msk.f32.vlgmr.msra.gmra.mxu0 %vm84_vm1, %v2023_v21 }
0x1011   :  { %3603 = vmatpush3.msra.mxu0 %v2025_v11  ;;  %3604 = vmatprep.mubr.msk.f32.mxu0 %vm3907_vm0, %v3906_v0 }
0x1012   :  { %3612 = vmatprep.subr.mxu0 %v3906_v0 }
0x1013   :  { %v2103_v26 = vpop.permute.xlu0 %2102  ;;  %v2101_v27 = vpop.permute.xlu1 %2100 }
0x1019   :  { %v3778_v33 = vpop.eup %3777 }
0x101a   :  { %v1874_v31 = vmul.f32 %v3778_v33, %v3774_v15 }
0x101c   :  { %3585 = vmatmul.mubr.msk.f32.vlgmr.msra.gmra.mxu1 %vm84_vm1, %v1874_v31 }
0x101d   :  { %v3780_v24 = vpop.eup %3779  ;;  %3588 = vmatpush3.msra.mxu1 %v4191_v60  ;;  %3589 = vmatprep.mubr.msk.f32.mxu1 %vm3907_vm0, %v3906_v0 }
0x101e   :  { %3597 = vmatprep.subr.mxu1 %v3906_v0  ;;  %v1875_v25 = vmul.f32 %v3780_v24, %v3776_v17 }
0x1020   :  { %3590 = vmatmul.mubr.msk.f32.vlgmr.msra.gmra.mxu1 %vm84_vm1, %v1875_v25 }
0x1021   :  { %3598 = vmatpush3.xpose.msk.msra.mxu1 %vm84_vm1, %v2103_v26  ;;  %3599 = vmatprep.mubr.msk.f32.mxu1 %vm3907_vm0, %v3906_v0 }
0x1022   :  { %3607 = vmatprep.subr.mxu1 %v3906_v0 }
0x1024   :  { %3600 = vmatmul.mubr.msk.f32.vlgmr.msra.gmra.mxu1 %vm84_vm1, %v2101_v27 }
0x1025   :  { %3608 = vmatpush3.msra.mxu1 %v2103_v26  ;;  %3609 = vmatprep.mubr.msk.f32.mxu1 %vm3907_vm0, %v3906_v0 }
0x1026   :  { %3617 = vmatprep.subr.mxu1 %v3906_v0 }
0x10d0   :  { %v2096_v28 = vpop.f32.mrf.mxu0 }
0x10d1   :  { %v2178_v29 = vsel %vm84_vm1, %v2096_v28, -inf }
0x10d2   :  { %2179 = vmax.xlane.f32.xlu1 %v2178_v29  ;;  %v3596_v30 = vpop.f32.mrf.mxu0 }
0x10dc   :  { %v4242_v32 = vpop.f32.mrf.mxu1 }
0x10de   :  { %v3586_v34 = vpop.f32.mrf.mxu1 }
0x10e0   :  { %v4244_v35 = vpop.f32.mrf.mxu1 }
0x10e2   :  { %v3591_v36 = vpop.f32.mrf.mxu1 }
0x10e3   :  { %2350 = vrot.lane.b32.xlu1 %v4183_v55, %s3909_s2 }
0x10e4   :  { %v2174_v37 = vpop.f32.mrf.mxu1 }
0x10e5   :  { %v2181_v38 = vsel %vm84_vm1, %v2174_v37, -inf }
0x10e6   :  { %2182 = vmax.xlane.f32.xlu0 %v2181_v38  ;;  %v3601_v39 = vpop.f32.mrf.mxu1 }
0x10e7   :  { %2348 = vrot.lane.b32.xlu1 %v4188_v59, %s3909_s2 }
0x10eb   :  { %2426 = vrot.lane.b32.xlu1 %v4200_v23, %s3909_s2 }
0x115b   :  { %v2180_v40 = vpop.xlane.xlu1 %2179 }
0x115c   :  { %v2184_v41 = vsub.f32 %v2096_v28, %v2180_v40 }
0x115e   :  { %v2186_v42 = vmul.f32 1.442695, %v2184_v41 }
0x115f   :  { %v2351_v52 = vpop.permute.xlu1 %2350 }
0x1160   :  { %3781 = vpow2.f32 %v2186_v42 }
0x1163   :  { %v2349_v56 = vpop.permute.xlu1 %2348 }
0x1167   :  { %v2427_v5 = vpop.permute.xlu1 %2426 }
0x116d   :  { %v3782_v43 = vpop.eup %3781 }
0x116e   :  { %v2190_v1 = vsel %vm84_vm1, %v3782_v43, 0.0 }
0x116f   :  { %v2183_v44 = vpop.xlane.xlu0 %2182  ;;  %2191 = vadd.xlane.f32.xlu0 %v2190_v1 }
0x1170   :  { %v2185_v45 = vsub.f32 %v2174_v37, %v2183_v44 }
0x1172   :  { %v2188_v46 = vmul.f32 1.442695, %v2185_v45 }
0x1174   :  { %3783 = vpow2.f32 %v2188_v46 }
0x1181   :  { %v3784_v48 = vpop.eup %3783 }
0x1182   :  { %v2193_v49 = vsel %vm84_vm1, %v3784_v48, 0.0 }
0x1183   :  { %2194 = vadd.xlane.f32.xlu0 %v2193_v49 }
0x1199   :  { %2428 = vrot.lane.b32.xlu0 %v4191_v60, %s3909_s2 }
0x11f8   :  { %v2192_v50 = vpop.xlane.xlu0 %2191 }
0x11f9   :  { %3785 = vrcp.f32 %v2192_v50 }
0x1206   :  { %v3786_v51 = vpop.eup %3785 }
0x1207   :  { %v2198_v53 = vmul.f32 %v3786_v51, %v3782_v43 }
0x1209   :  { %3605 = vmatmul.mubr.msk.f32.vlgmr.msra.gmra.mxu0 %vm84_vm1, %v2198_v53 }
0x120a   :  { %3613 = vmatpush3.xpose.msk.msra.mxu0 %vm84_vm1, %v2351_v52  ;;  %3614 = vmatprep.mubr.msk.f32.mxu0 %vm3907_vm0, %v3906_v0 }
0x120b   :  { %3622 = vmatprep.subr.mxu0 %v3906_v0 }
0x120c   :  { %v2195_v57 = vpop.xlane.xlu0 %2194 }
0x120d   :  { %3787 = vrcp.f32 %v2195_v57  ;;  %3615 = vmatmul.mubr.msk.f32.vlgmr.msra.gmra.mxu0 %vm84_vm1, %v2349_v56 }
0x120e   :  { %3623 = vmatpush3.msra.mxu0 %v2351_v52  ;;  %3624 = vmatprep.mubr.msk.f32.mxu0 %vm3907_vm0, %v3906_v0 }
0x120f   :  { %3632 = vmatprep.subr.mxu0 %v3906_v0 }
0x1210   :  { %v2429_v63 = vpop.permute.xlu0 %2428 }
0x121a   :  { %v3788_v61 = vpop.eup %3787 }
0x121b   :  { %v2199_v62 = vmul.f32 %v3788_v61, %v3784_v48 }
0x121d   :  { %3610 = vmatmul.mubr.msk.f32.vlgmr.msra.gmra.mxu1 %vm84_vm1, %v2199_v62 }
0x121e   :  { %3618 = vmatpush3.xpose.msk.msra.mxu1 %vm84_vm1, %v2429_v63  ;;  %3619 = vmatprep.mubr.msk.f32.mxu1 %vm3907_vm0, %v3906_v0 }
0x121f   :  { %3627 = vmatprep.subr.mxu1 %v3906_v0 }
0x1221   :  { %3620 = vmatmul.mubr.msk.f32.vlgmr.msra.gmra.mxu1 %vm84_vm1, %v2427_v5 }
0x1222   :  { %3628 = vmatpush3.msra.mxu1 %v2429_v63  ;;  %3629 = vmatprep.mubr.msk.f32.mxu1 %vm3907_vm0, %v3906_v0 }
0x1223   :  { %3637 = vmatprep.subr.mxu1 %v3906_v0 }
0x12c9   :  { %v4275_v6 = vpop.f32.mrf.mxu0 }
0x12cb   :  { %v3606_v7 = vpop.f32.mrf.mxu0 }
0x12cd   :  { %v2422_v8 = vpop.f32.mrf.mxu0 }
0x12ce   :  { %v2504_v9 = vsel %vm84_vm1, %v2422_v8, -inf }
0x12cf   :  { %2505 = vmax.xlane.f32.xlu1 %v2504_v9  ;;  %v3616_v10 = vpop.f32.mrf.mxu0 }
0x12dd   :  { %v2344_v11 = vpop.f32.mrf.mxu1 }
0x12de   :  { %v3706_v12 = vpack.i.bf16 %v2344_v11, %v4275_v6 }
0x12df   :  { %v3611_v13 = vpop.f32.mrf.mxu1 }
0x12e0   :  { %2676 = vrot.lane.b32.xlu1 %v4183_v55, %s3910_s15 }
0x12e1   :  { %v2500_v14 = vpop.f32.mrf.mxu1 }
0x12e2   :  { %v2507_v15 = vsel %vm84_vm1, %v2500_v14, -inf }
0x12e3   :  { %2508 = vmax.xlane.f32.xlu0 %v2507_v15  ;;  %v3621_v16 = vpop.f32.mrf.mxu1  ;;  %v3728_v15 = vld [vmem:[#allocation5 + $0x10] sm:$0xff]  }
0x12e4   :  { %2674 = vrot.lane.b32.xlu1 %v4188_v59, %s3910_s15 }
0x12e8   :  { %2752 = vrot.lane.b32.xlu1 %v4200_v23, %s3910_s15 }
0x1358   :  { %v2506_v17 = vpop.xlane.xlu1 %2505 }
0x1359   :  { %v2510_v18 = vsub.f32 %v2422_v8, %v2506_v17 }
0x135b   :  { %v2512_v20 = vmul.f32 1.442695, %v2510_v18 }
0x135c   :  { %v2677_v27 = vpop.permute.xlu1 %2676 }
0x135d   :  { %3789 = vpow2.f32 %v2512_v20 }
0x1360   :  { %v2675_v29 = vpop.permute.xlu1 %2674 }
0x1364   :  { %v2753_v38 = vpop.permute.xlu1 %2752 }
0x136a   :  { %v3790_v21 = vpop.eup %3789 }
0x136b   :  { %v2516_v22 = vsel %vm84_vm1, %v3790_v21, 0.0 }
0x136c   :  { %v2509_v33 = vpop.xlane.xlu0 %2508  ;;  %2517 = vadd.xlane.f32.xlu0 %v2516_v22 }
0x136d   :  { %v2511_v31 = vsub.f32 %v2500_v14, %v2509_v33 }
0x136f   :  { %v2514_v24 = vmul.f32 1.442695, %v2511_v31 }
0x1371   :  { %3791 = vpow2.f32 %v2514_v24 }
0x137e   :  { %v3792_v25 = vpop.eup %3791 }
0x137f   :  { %v2519_v26 = vsel %vm84_vm1, %v3792_v25, 0.0 }
0x1380   :  { %2520 = vadd.xlane.f32.xlu0 %v2519_v26 }
0x1396   :  { %2754 = vrot.lane.b32.xlu0 %v4191_v60, %s3910_s15 }
0x13f5   :  { %v2518_v59 = vpop.xlane.xlu0 %2517 }
0x13f6   :  { %3793 = vrcp.f32 %v2518_v59 }
0x1403   :  { %v3794_v23 = vpop.eup %3793 }
0x1404   :  { %v2524_v28 = vmul.f32 %v3794_v23, %v3790_v21 }
0x1406   :  { %3625 = vmatmul.mubr.msk.f32.vlgmr.msra.gmra.mxu0 %vm84_vm1, %v2524_v28 }
0x1407   :  { %3633 = vmatpush3.xpose.msk.msra.mxu0 %vm84_vm1, %v2677_v27  ;;  %3634 = vmatprep.mubr.msk.f32.mxu0 %vm3907_vm0, %v3906_v0 }
0x1408   :  { %3642 = vmatprep.subr.mxu0 %v3906_v0 }
0x1409   :  { %v2521_v30 = vpop.xlane.xlu0 %2520 }
0x140a   :  { %3795 = vrcp.f32 %v2521_v30  ;;  %3635 = vmatmul.mubr.msk.f32.vlgmr.msra.gmra.mxu0 %vm84_vm1, %v2675_v29 }
0x140b   :  { %3643 = vmatpush3.msra.mxu0 %v2677_v27  ;;  %3644 = vmatprep.mubr.msk.f32.mxu0 %vm3907_vm0, %v3906_v0 }
0x140c   :  { %3652 = vmatprep.subr.bf16.mxu0 %v3906_v0 }
0x140d   :  { %v2755_v37 = vpop.permute.xlu0 %2754 }
0x1417   :  { %v3796_v34 = vpop.eup %3795 }
0x1418   :  { %v2525_v36 = vmul.f32 %v3796_v34, %v3792_v25 }
0x141a   :  { %3630 = vmatmul.mubr.msk.f32.vlgmr.msra.gmra.mxu1 %vm84_vm1, %v2525_v36 }
0x141b   :  { %3638 = vmatpush3.xpose.msk.msra.mxu1 %vm84_vm1, %v2755_v37  ;;  %3639 = vmatprep.mubr.msk.f32.mxu1 %vm3907_vm0, %v3906_v0 }
0x141c   :  { %3647 = vmatprep.subr.mxu1 %v3906_v0 }
0x141e   :  { %3640 = vmatmul.mubr.msk.f32.vlgmr.msra.gmra.mxu1 %vm84_vm1, %v2753_v38 }
0x141f   :  { %3648 = vmatpush3.msra.mxu1 %v2755_v37  ;;  %3649 = vmatprep.mubr.msk.f32.mxu1 %vm3907_vm0, %v3906_v0 }
0x1420   :  { %3660 = vmatprep.subr.bf16.mxu1 %v3906_v0 }
0x14c6   :  { %v2596_v39 = vpop.f32.mrf.mxu0 }
0x14c8   :  { %v3626_v40 = vpop.f32.mrf.mxu0 }
0x14ca   :  { %v2748_v41 = vpop.f32.mrf.mxu0 }
0x14cb   :  { %v2830_v42 = vsel %vm84_vm1, %v2748_v41, -inf }
0x14cc   :  { %2831 = vmax.xlane.f32.xlu1 %v2830_v42  ;;  %v3636_v43 = vpop.f32.mrf.mxu0 }
0x14da   :  { %v2670_v1 = vpop.f32.mrf.mxu1 }
0x14db   :  { %v3711_v44 = vpack.i.bf16 %v2670_v1, %v2596_v39 }
0x14dc   :  { %v3631_v45 = vpop.f32.mrf.mxu1 }
0x14dd   :  { %3707 = vrot.lane.b32.xlu1 %v3706_v12, %s3904_s8  ;;  %v3727_v12 = vld [vmem:[#allocation5 + $0x18] sm:$0xff]  }
0x14de   :  { %v2826_v46 = vpop.f32.mrf.mxu1 }
0x14df   :  { %v2833_v48 = vsel %vm84_vm1, %v2826_v46, -inf }
0x14e0   :  { %2834 = vmax.xlane.f32.xlu0 %v2833_v48  ;;  %v3641_v49 = vpop.f32.mrf.mxu1 }
0x1555   :  { %v2832_v50 = vpop.xlane.xlu1 %2831 }
0x1556   :  { %v2836_v51 = vsub.f32 %v2748_v41, %v2832_v50 }
0x1558   :  { %v2838_v52 = vmul.f32 1.442695, %v2836_v51 }
0x1559   :  { %v3708_v20 = vpop.permute.xlu1 %3707 }
0x155a   :  { %3797 = vpow2.f32 %v2838_v52  ;;  %v3710_v22 = vunpack.i.h.bf16 %v3708_v20  ;;  %v3709_v33 = vunpack.i.l.bf16 %v3708_v20  ;;  %v3732_v20 = vld [vmem:[%s4390_s3 + $0x10] sm:$0xff]  }
0x155c   :  { %v3025_v26 = vsel %vm84_vm1, %v4244_v35, %v3710_v22  ;;  %v3024_v59 = vsel %vm84_vm1, %v4242_v32, %v3709_v33  ;;  %v4337_v32 = vld [vmem:[%s4391_s4 + $0x8] sm:$0x3f] }
0x155d   :  { %v3034_v35 = vrot.slane %v4337_v32, %v1418_v4 }
0x1567   :  { %v3798_v53 = vpop.eup %3797 }
0x1568   :  { %v2842_v56 = vsel %vm84_vm1, %v3798_v53, 0.0 }
0x1569   :  { %v2835_v57 = vpop.xlane.xlu0 %2834  ;;  %2843 = vadd.xlane.f32.xlu0 %v2842_v56 }
0x156a   :  { %v2837_v61 = vsub.f32 %v2826_v46, %v2835_v57  ;;  %v3729_v57 = vld [vmem:[#allocation7 + $0x18] sm:$0xff]  }
0x156c   :  { %v2840_v62 = vmul.f32 1.442695, %v2837_v61  ;;  %v3731_v61 = vld [vmem:[%s4390_s3 + $0x18] sm:$0xff]   ;;  %s3913_s3 = smov [#allocation8]  }
0x156e   :  { %3799 = vpow2.f32 %v2840_v62 }
0x157b   :  { %v3800_v63 = vpop.eup %3799 }
0x157c   :  { %v2845_v5 = vsel %vm84_vm1, %v3800_v63, 0.0 }
0x157d   :  { %2846 = vadd.xlane.f32.xlu0 %v2845_v5 }
0x1593   :  { %3712 = vrot.lane.b32.xlu0 %v3711_v44, %s3911_s16 }
0x15f2   :  { %v2844_v6 = vpop.xlane.xlu0 %2843 }
0x15f3   :  { %3801 = vrcp.f32 %v2844_v6 }
0x1600   :  { %v3802_v7 = vpop.eup %3801 }
0x1601   :  { %v2850_v8 = vmul.f32 %v3802_v7, %v3798_v53 }
0x1603   :  { %3645 = vmatmul.mubr.msk.f32.vlgmr.msra.gmra.mxu0 %vm84_vm1, %v2850_v8 }
0x1604   :  { %3656 = vmatprep.mubr.msk.bf16.mxu0 %vm3907_vm0, %v3906_v0  ;;  %3653 = vmatpush3.bf16.msra.mxu0 %v3727_v12 }
0x1605   :  { %3654 = vmatprep.subr.bf16.mxu0 %v3906_v0 }
0x1606   :  { %v2847_v9 = vpop.xlane.xlu0 %2846 }
0x1607   :  { %3803 = vrcp.f32 %v2847_v9 }
0x1608   :  { %3655 = vmatpush3.bf16.msra.mxu0 %v3728_v15 }
0x1609   :  { %3668 = vmatprep.subr.bf16.mxu0 %v3906_v0 }
0x160a   :  { %v3713_v21 = vpop.permute.xlu0 %3712 }
0x160b   :  { %v3715_v31 = vunpack.i.h.bf16 %v3713_v21  ;;  %v3714_v24 = vunpack.i.l.bf16 %v3713_v21 }
0x160d   :  { %v3026_v28 = vsel %vm1409_vm2, %v3024_v59, %v3714_v24  ;;  %v3027_v29 = vsel %vm1409_vm2, %v3025_v26, %v3715_v31 }
0x1614   :  { %v3804_v10 = vpop.eup %3803 }
0x1615   :  { %v2851_v11 = vmul.f32 %v3804_v10, %v3800_v63 }
0x1617   :  { %3650 = vmatmul.mubr.msk.f32.vlgmr.msra.gmra.mxu1 %vm84_vm1, %v2851_v11  ;;  %v3122_v11 = vrot.slane %v4337_v32, %v1508_v54  ;;  %v3380_v54 = vld [vmem:[%s4392_s5 + $0x1] ss:$0 sm:$0xff]  ;;  %s3301_s5 = sshll.u32 %s3913_s3, 4  ;;  %s3302_s5 = int_to_ptr.vmem [resolvable:$true] %s3301_s5 }
0x1618   :  { %3664 = vmatprep.mubr.msk.bf16.mxu1 %vm3907_vm0, %v3906_v0  ;;  %3661 = vmatpush3.bf16.msra.mxu1 %v3729_v57  ;;  %s3873_s1 = scalar_lea.vmem %s3302_s5, 256  ;;  %p3878_p2 = scmp.lt.s32.totalorder %s3302_s5, %s3302_s5 }
0x1619   :  { %3662 = vmatprep.subr.bf16.mxu1 %v3906_v0  ;;  %p3874_p1 = scmp.ne.s32.totalorder %s3302_s5, %s3873_s1  ;;  %p3879_p3 = scmp.lt.s32.totalorder %s3873_s1, %s3873_s1 }
0x161b   :  { %p3880_p4 = por %p3879_p3, %p3878_p2 }
0x161d   :  { %p3881_p5 = pnand %p3880_p4, %p3874_p1 }
0x16c3   :  { %v2922_v13 = vpop.f32.mrf.mxu0 }
0x16c5   :  { %v3646_v14 = vpop.f32.mrf.mxu0 }
0x16d7   :  { %v2996_v16 = vpop.f32.mrf.mxu1 }
0x16d8   :  { %v3716_v17 = vpack.i.bf16 %v2996_v16, %v2922_v13 }
0x16d9   :  { %v3651_v18 = vpop.f32.mrf.mxu1 }
0x16da   :  { %3717 = vrot.lane.b32.xlu1 %v3716_v17, %s3912_s17 }
0x174c   :  { %v3718_v25 = vpop.permute.xlu1 %3717 }
0x174d   :  { %v3720_v23 = vunpack.i.h.bf16 %v3718_v25  ;;  %v3719_v27 = vunpack.i.l.bf16 %v3718_v25 }
0x174f   :  { %v3029_v30 = vsel %vm1412_vm3, %v3027_v29, %v3720_v23  ;;  %v3028_v34 = vsel %vm1412_vm3, %v3026_v28, %v3719_v27  ;;  %v3200_v23 = vrot.slane %v4337_v32, %v1586_v19 }
0x1750   :  { %v3030_v36 = vpack.c.bf16 %v3029_v30, %v3028_v34 }
0x1752   :  { %3657 = vmatmul.mubr.msk.bf16.vlgmr.msra.gmra.mxu0 %vm1432_vm4, %v3030_v36 }
0x1753   :  { %3672 = vmatprep.mubr.msk.bf16.mxu0 %vm3907_vm0, %v3906_v0  ;;  %3669 = vmatpush3.bf16.xpose.msra.mxu0 %v3731_v61 }
0x1754   :  { %3670 = vmatprep.subr.bf16.mxu0 %v3906_v0  ;;  %v3128_v0 = vrot.slane %v4337_v32, %v1514_v58 }
0x175b   :  { %3671 = vmatpush3.bf16.xpose.msra.mxu0 %v3732_v20 }
0x1812   :  { %v3084_v37 = vpop.f32.mrf.mxu0 }
0x1813   :  { %v3085_v38 = vadd.f32 %v3084_v37, %v3034_v35 }
0x1814   :  { %v3658_v39 = vpop.f32.mrf.mxu0 }
0x1815   :  { %v3091_v40 = vadd.f32 %v3085_v38, %v4183_v55 }
0x1816   :  { %v3087_v41 = vpop.f32.mrf.mxu0 }
0x1817   :  { %v3088_v42 = vadd.f32 %v3087_v41, %v3034_v35  ;;  %v3093_v43 = vsel %vm1432_vm4, %v3091_v40, 0.0 }
0x1818   :  { %3094 = vadd.xlane.f32.xlu1 %v3093_v43  ;;  %v3659_v1 = vpop.f32.mrf.mxu0 }
0x1819   :  { %v3092_v44 = vadd.f32 %v3088_v42, %v4191_v60  ;;  %v3730_v60 = vld [vmem:[#allocation7 + $0x10] sm:$0xff]  }
0x181a   :  { %3663 = vmatpush3.bf16.msra.mxu1 %v3730_v60  ;;  %v3291_v60 = vrot.slane %v4337_v32, %v1677_v47 }
0x181b   :  { %v3096_v45 = vsel %vm1432_vm4, %v3092_v44, 0.0 }
0x181c   :  { %3097 = vadd.xlane.f32.xlu0 %v3096_v45 }
0x18a1   :  { %v3095_v46 = vpop.xlane.xlu1 %3094 }
0x18a2   :  { %v3099_v48 = vmul.f32 0.03125, %v3095_v46 }
0x18a4   :  { %v3101_v49 = vsub.f32 %v3091_v40, %v3099_v48 }
0x18a5   :  { %v3098_v4 = vpop.xlane.xlu0 %3097 }
0x18a6   :  { %v3100_v50 = vmul.f32 0.03125, %v3098_v4  ;;  %v3103_v51 = vmul.f32 %v3101_v49, %v3101_v49 }
0x18a8   :  { %v3102_v52 = vsub.f32 %v3092_v44, %v3100_v50  ;;  %v3105_v55 = vsel %vm1432_vm4, %v3103_v51, 0.0 }
0x18a9   :  { %3106 = vadd.xlane.f32.xlu0 %v3105_v55 }
0x18aa   :  { %v3104_v53 = vmul.f32 %v3102_v52, %v3102_v52 }
0x18ac   :  { %v3108_v56 = vsel %vm1432_vm4, %v3104_v53, 0.0  ;;  %v3285_v53 = vrot.slane %v4337_v32, %v1671_v2 }
0x18ad   :  { %3109 = vadd.xlane.f32.xlu1 %v3108_v56 }
0x1932   :  { %v3107_v62 = vpop.xlane.xlu0 %3106 }
0x1933   :  { %v3111_v63 = vmul.f32 0.03125, %v3107_v62 }
0x1935   :  { %v3113_v5 = vadd.f32 1e-06, %v3111_v63 }
0x1936   :  { %v3110_v6 = vpop.xlane.xlu1 %3109 }
0x1937   :  { %3805 = vrsqrt.f32 %v3113_v5  ;;  %v3112_v7 = vmul.f32 0.03125, %v3110_v6 }
0x1939   :  { %v3114_v8 = vadd.f32 1e-06, %v3112_v7 }
0x193b   :  { %3807 = vrsqrt.f32 %v3114_v8 }
0x1944   :  { %v3806_v9 = vpop.eup %3805 }
0x1945   :  { %v3117_v10 = vmul.f32 %v3806_v9, %v3101_v49 }
0x1947   :  { %v3123_v14 = vmul.f32 %v3122_v11, %v3117_v10 }
0x1948   :  { %v3808_v12 = vpop.eup %3807 }
0x1949   :  { %v3118_v13 = vmul.f32 %v3808_v12, %v3102_v52  ;;  %v3129_v16 = vadd.f32 %v3128_v0, %v3123_v14 }
0x194b   :  { %v3124_v15 = vmul.f32 %v3122_v11, %v3118_v13 }
0x194d   :  { %v3130_v17 = vadd.f32 %v3128_v0, %v3124_v15 }
0x194f   :  { %v3131_v18 = vpack.c.bf16 %v3130_v17, %v3129_v16 }
0x1951   :  { %3665 = vmatmul.mubr.msk.bf16.vlgmr.msra.gmra.mxu1 %vm1432_vm4, %v3131_v18 }
0x1a11   :  { %v3187_v21 = vpop.f32.mrf.mxu1 }
0x1a12   :  { %v3188_v33 = vadd.f32 %v3380_v54, %v3187_v21 }
0x1a13   :  { %v3666_v22 = vpop.f32.mrf.mxu1 }
0x1a14   :  { %v3194_v25 = vmax.f32 %v3188_v33, 0.0 }
0x1a15   :  { %v3190_v31 = vpop.f32.mrf.mxu1 }
0x1a16   :  { %v3191_v58 = vadd.f32 %v3380_v54, %v3190_v31 }
0x1a17   :  { %v3667_v24 = vpop.f32.mrf.mxu1 }
0x1a18   :  { %v3195_v26 = vmax.f32 %v3191_v58, 0.0 }
0x1a1a   :  { %v3196_v59 = vpack.c.bf16 %v3195_v26, %v3194_v25 }
0x1a1c   :  { %3673 = vmatmul.mubr.bf16.vlgmr.msra.gmra.mxu0 %v3196_v59 }
0x1adc   :  { %v3247_v27 = vpop.f32.mrf.mxu0 }
0x1add   :  { %v3248_v28 = vadd.f32 %v3247_v27, %v3200_v23 }
0x1ade   :  { %v3674_v29 = vpop.f32.mrf.mxu0 }
0x1adf   :  { %v3254_v30 = vadd.f32 %v3248_v28, %v3129_v16 }
0x1ae0   :  { %v3250_v34 = vpop.f32.mrf.mxu0 }
0x1ae1   :  { %v3251_v36 = vadd.f32 %v3250_v34, %v3200_v23  ;;  %v3256_v35 = vsel %vm1432_vm4, %v3254_v30, 0.0 }
0x1ae2   :  { %3257 = vadd.xlane.f32.xlu0 %v3256_v35  ;;  %v3675_v37 = vpop.f32.mrf.mxu0 }
0x1ae3   :  { %v3255_v38 = vadd.f32 %v3251_v36, %v3130_v17 }
0x1ae5   :  { %v3259_v39 = vsel %vm1432_vm4, %v3255_v38, 0.0 }
0x1ae6   :  { %3260 = vadd.xlane.f32.xlu1 %v3259_v39 }
0x1b6b   :  { %v3258_v40 = vpop.xlane.xlu0 %3257 }
0x1b6c   :  { %v3262_v41 = vmul.f32 0.03125, %v3258_v40 }
0x1b6e   :  { %v3264_v42 = vsub.f32 %v3254_v30, %v3262_v41 }
0x1b6f   :  { %v3261_v43 = vpop.xlane.xlu1 %3260 }
0x1b70   :  { %v3263_v1 = vmul.f32 0.03125, %v3261_v43  ;;  %v3266_v19 = vmul.f32 %v3264_v42, %v3264_v42 }
0x1b72   :  { %v3265_v44 = vsub.f32 %v3255_v38, %v3263_v1  ;;  %v3268_v45 = vsel %vm1432_vm4, %v3266_v19, 0.0 }
0x1b73   :  { %3269 = vadd.xlane.f32.xlu0 %v3268_v45 }
0x1b74   :  { %v3267_v46 = vmul.f32 %v3265_v44, %v3265_v44 }
0x1b76   :  { %v3271_v48 = vsel %vm1432_vm4, %v3267_v46, 0.0 }
0x1b77   :  { %3272 = vadd.xlane.f32.xlu1 %v3271_v48 }
0x1bfc   :  { %v3270_v49 = vpop.xlane.xlu0 %3269 }
0x1bfd   :  { %v3274_v4 = vmul.f32 0.03125, %v3270_v49 }
0x1bff   :  { %v3276_v50 = vadd.f32 1e-06, %v3274_v4 }
0x1c00   :  { %v3273_v51 = vpop.xlane.xlu1 %3272 }
0x1c01   :  { %3809 = vrsqrt.f32 %v3276_v50  ;;  %v3275_v52 = vmul.f32 0.03125, %v3273_v51 }
0x1c03   :  { %v3277_v55 = vadd.f32 1e-06, %v3275_v52 }
0x1c05   :  { %3811 = vrsqrt.f32 %v3277_v55 }
0x1c0e   :  { %v3810_v56 = vpop.eup %3809 }
0x1c0f   :  { %v3280_v57 = vmul.f32 %v3810_v56, %v3264_v42 }
0x1c11   :  { %v3286_v61 = vmul.f32 %v3285_v53, %v3280_v57 }
0x1c12   :  { %v3812_v62 = vpop.eup %3811 }
0x1c13   :  { %v3281_v63 = vmul.f32 %v3812_v62, %v3265_v44  ;;  %v3292_v5 = vadd.f32 %v3291_v60, %v3286_v61 }
0x1c15   :  { %v3287_v6 = vmul.f32 %v3285_v53, %v3281_v63  ;;  %3294 = vst.msk [vmem:[#allocation8] sm:$0xff] %vm1432_vm4, %v3292_v5 }
0x1c17   :  { %v3293_v7 = vadd.f32 %v3291_v60, %v3287_v6 }
0x1c19   :  { %3295 = vst.msk [vmem:[#allocation8 + $0x8] sm:$0xff] %vm1432_vm4, %v3293_v7 }
0x1c1a   :  { %3884 = shalt.err (!%p3881_p5)
}
0x1c1b   :  { %3307 = dma.vmem_to_hbm [thread:$0]  %s3302_s5, 256, %s4393_s6, [#allocation4], %s3903_s7, %s3903_s7, %s3904_s8  }
0x1c1c   :  { %3897 = dma.done.wait [#allocation4], 256  }
0x1c1d   :  { %3898 = vsyncadd [#allocation4], 4294967040 }
0x1c1e   :  { %3311 = vsyncpa [#allocation3], 1 }
0x1c1f   :  { %3312 = vsyncpa [#allocation6], 1 }
0x1c20   :  { %3313 = vsyncpa [#allocation4], 1 }

</bundles_post_ra>
